<compile_context>
chip_gen: v6e
topology: v6e:2x2x1
jax: 0.10.0
libtpu: 0.0.40
codegen_flags: <defaults>
</compile_context>

<pallas_src>
import numpy as np
import jax
import jax.numpy as jnp
from jax.experimental import pallas as pl
from jax.experimental.pallas import tpu as pltpu

_BN_EPS = 1e-5
_VMEM_LIMIT = 48 * 1024 * 1024  # explicit scoped-VMEM cap; safe on v7x (64 MiB physical)


def _round_up(x, m):
    return (x + m - 1) // m * m


def _compiler_params(sem):
    return pltpu.CompilerParams(dimension_semantics=sem,
                                vmem_limit_bytes=_VMEM_LIMIT)


# ----------------------------------------------------------------------------
# Fused convolution kernel (channels-last), im2col folded into the kernel.
#   out[b, ho, wo, :] = act( (sum_{dh,dw} x_pad[b, sh*ho+dh, sw*wo+dw, :] @ W[dh,dw])
#                             * scale + bias [+ residual] )
# The stride along W is handled by splitting the padded activation into `sw` phases on
# the host (cheap, ~1x copy), so every in-kernel tap is a contiguous static slice.
# ----------------------------------------------------------------------------
def _conv_kernel_factory(*, n_phase, kh, kw, sh, Ho, Wo, relu, has_res,
                         tap_phase, tap_off):
    def kernel(*refs):
        o_ref = refs[-1]
        x_refs = refs[:n_phase]
        w_ref = refs[n_phase]
        s_ref = refs[n_phase + 1]
        b_ref = refs[n_phase + 2]
        res_ref = refs[n_phase + 3] if has_res else None

        scale = s_ref[...]          # (1, tn) f32
        bias = b_ref[...]           # (1, tn) f32
        for ho in range(Ho):
            acc = None
            for dh in range(kh):
                row = sh * ho + dh
                for dw in range(kw):
                    lhs = x_refs[tap_phase[dw]][0, row,
                                                tap_off[dw]:tap_off[dw] + Wo, :]
                    part = jnp.dot(lhs, w_ref[dh, dw],
                                   preferred_element_type=jnp.float32)
                    acc = part if acc is None else acc + part
            r = acc * scale + bias
            if has_res:
                r = r + res_ref[0, ho].astype(jnp.float32)
            if relu:
                r = jnp.maximum(r, 0.0)
            o_ref[0, ho] = r.astype(o_ref.dtype)

    return kernel


def conv2d_fused(x, w, stride, padding, scale=None, bias=None, relu=False,
                 residual=None, out_dtype=jnp.bfloat16):
    """x: (B, H, W, Cin) channels-last; w: (Cout, Cin, kh, kw) PyTorch layout."""
    B, H, W, Cin = x.shape
    Cout, Cin2, kh, kw = w.shape
    assert Cin2 == Cin
    sh, sw = stride
    ph, pw = padding
    Ho = (H + 2 * ph - kh) // sh + 1
    Wo = (W + 2 * pw - kw) // sw + 1
    Hp = H + 2 * ph
    Lph = Wo + (kw - 1) // sw          # phase length needed by the largest tap offset
    Wp_target = sw * Lph

    right = Wp_target - W - pw
    xp = jnp.pad(x, ((0, 0), (ph, ph), (pw, max(right, 0)), (0, 0)))
    if right < 0:
        xp = xp[:, :, :Wp_target, :]

    used = sorted({dw % sw for dw in range(kw)})
    phase_pos = {p: i for i, p in enumerate(used)}
    phases = [xp[:, :, p::sw, :].astype(jnp.bfloat16) for p in used]
    tap_phase = tuple(phase_pos[dw % sw] for dw in range(kw))
    tap_off = tuple(dw // sw for dw in range(kw))

    wt = jnp.transpose(w, (2, 3, 1, 0)).astype(jnp.bfloat16)   # (kh, kw, Cin, Cout)
    if scale is None:
        scale = jnp.ones((Cout,), jnp.float32)
    if bias is None:
        bias = jnp.zeros((Cout,), jnp.float32)
    scale = scale.reshape(1, Cout).astype(jnp.float32)
    bias = bias.reshape(1, Cout).astype(jnp.float32)

    tn = Cout if Cout <= 256 else 256          # 256-wide N tiles for big Cout (MXU width)
    nj = Cout // tn

    has_res = residual is not None
    in_arrays = phases + [wt, scale, bias]
    in_specs = ([pl.BlockSpec((1, Hp, Lph, Cin), lambda b, j: (b, 0, 0, 0))
                 for _ in phases] +
                [pl.BlockSpec((kh, kw, Cin, tn), lambda b, j: (0, 0, 0, j)),
                 pl.BlockSpec((1, tn), lambda b, j: (0, j)),
                 pl.BlockSpec((1, tn), lambda b, j: (0, j))])
    if has_res:
        in_arrays.append(residual.astype(jnp.bfloat16))
        in_specs.append(pl.BlockSpec((1, Ho, Wo, tn), lambda b, j: (b, 0, 0, j)))

    kernel = _conv_kernel_factory(n_phase=len(phases), kh=kh, kw=kw, sh=sh,
                                  Ho=Ho, Wo=Wo, relu=relu, has_res=has_res,
                                  tap_phase=tap_phase, tap_off=tap_off)

    out = pl.pallas_call(
        kernel,
        out_shape=jax.ShapeDtypeStruct((B, Ho, Wo, Cout), out_dtype),
        grid_spec=pltpu.PrefetchScalarGridSpec(
            num_scalar_prefetch=0,
            grid=(B, nj),
            in_specs=in_specs,
            out_specs=pl.BlockSpec((1, Ho, Wo, tn), lambda b, j: (b, 0, 0, j)),
        ),
        compiler_params=_compiler_params(("parallel", "parallel")),
    )(*in_arrays)
    return out


def conv1d_fused(x, w, stride, padding, **kwargs):
    """x: (B, L, Cin) channels-last; w: (Cout, Cin, k)."""
    y = conv2d_fused(x[:, None, :, :], w[:, :, None, :], (1, stride),
                     (0, padding), **kwargs)
    return y[:, 0]                               # (B, Lo, Cout)


def conv2d_stem(x, w, stride, padding, scale, bias, relu):
    """7x7/s2 stem (Cin=3): per-tap dots would waste the MXU lanes, so do a tiny
    host-side im2col (~1.4 MB) and feed it to the same fused kernel as a 1x1 conv."""
    B, H, W, Cin = x.shape
    Cout, _, kh, kw = w.shape
    sh, sw = stride
    ph, pw = padding
    Ho = (H + 2 * ph - kh) // sh + 1
    Wo = (W + 2 * pw - kw) // sw + 1
    xp = jnp.pad(x, ((0, 0), (ph, ph), (pw, pw), (0, 0)))
    cols = []
    for dh in range(kh):
        for dw in range(kw):
            cols.append(xp[:, dh:dh + sh * (Ho - 1) + 1:sh,
                           dw:dw + sw * (Wo - 1) + 1:sw, :])
    patches = jnp.concatenate(cols, axis=-1)                 # (B, Ho, Wo, kh*kw*Cin)
    wm = jnp.transpose(w, (0, 2, 3, 1)).reshape(Cout, kh * kw * Cin)
    return conv2d_fused(patches, wm[:, :, None, None], (1, 1), (0, 0),
                        scale=scale, bias=bias, relu=relu)


# ----------------------------------------------------------------------------
# MaxPool2d(kernel=3, stride=2, padding=1), channels-last Pallas kernel.
# ----------------------------------------------------------------------------
def _maxpool_kernel_factory(*, n_phase, kh, kw, sh, Ho, Wo, tap_phase, tap_off):
    def kernel(*refs):
        o_ref = refs[-1]
        x_refs = refs[:n_phase]
        for ho in range(Ho):
            r = None
            for dh in range(kh):
                row = sh * ho + dh
                for dw in range(kw):
                    v = x_refs[tap_phase[dw]][0, row,
                                              tap_off[dw]:tap_off[dw] + Wo, :]
                    r = v if r is None else jnp.maximum(r, v)
            o_ref[0, ho] = r.astype(o_ref.dtype)

    return kernel


def maxpool2d(x, kernel=3, stride=2, padding=1):
    B, H, W, C = x.shape
    kh = kw = kernel
    sh = sw = stride
    ph = pw = padding
    Ho = (H + 2 * ph - kh) // sh + 1
    Wo = (W + 2 * pw - kw) // sw + 1
    Hp = H + 2 * ph
    Lph = Wo + (kw - 1) // sw
    Wp_target = sw * Lph

    right = Wp_target - W - pw
    xp = jnp.pad(x, ((0, 0), (ph, ph), (pw, max(right, 0)), (0, 0)),
                 constant_values=-jnp.inf)
    if right < 0:
        xp = xp[:, :, :Wp_target, :]

    used = sorted({dw % sw for dw in range(kw)})
    pos = {p: i for i, p in enumerate(used)}
    phases = [xp[:, :, p::sw, :] for p in used]
    tap_phase = tuple(pos[dw % sw] for dw in range(kw))
    tap_off = tuple(dw // sw for dw in range(kw))

    kfn = _maxpool_kernel_factory(n_phase=len(phases), kh=kh, kw=kw, sh=sh,
                                  Ho=Ho, Wo=Wo, tap_phase=tap_phase,
                                  tap_off=tap_off)
    return pl.pallas_call(
        kfn,
        out_shape=jax.ShapeDtypeStruct((B, Ho, Wo, C), x.dtype),
        grid_spec=pltpu.PrefetchScalarGridSpec(
            num_scalar_prefetch=0,
            grid=(B,),
            in_specs=[pl.BlockSpec((1, Hp, Lph, C), lambda b: (b, 0, 0, 0))
                      for _ in phases],
            out_specs=pl.BlockSpec((1, Ho, Wo, C), lambda b: (b, 0, 0, 0)),
        ),
        compiler_params=_compiler_params(("parallel",)),
    )(*phases)


# ----------------------------------------------------------------------------
# Classifier head: Linear(2048,256) -> Dropout(identity) -> Linear(256,2) as ONE kernel.
# ----------------------------------------------------------------------------
def _fc_head_kernel(x_ref, w1_ref, b1_ref, w2_ref, b2_ref, o_ref):
    h = jnp.dot(x_ref[...], w1_ref[...], preferred_element_type=jnp.float32)
    h = h + b1_ref[...]
    # TODO(synk): Dropout(0.5) between the two Linear layers is identity (eval mode).
    o = jnp.dot(h.astype(jnp.bfloat16), w2_ref[...],
                preferred_element_type=jnp.float32)
    o_ref[...] = o + b2_ref[...]


def fc_head(feats, w1, b1, w2, b2):
    B, K = feats.shape
    N1 = w1.shape[0]
    N2 = w2.shape[0]
    Bp = _round_up(max(B, 8), 8)
    N2p = _round_up(max(N2, 128), 128)
    xpad = jnp.zeros((Bp, K), jnp.bfloat16).at[:B].set(feats.astype(jnp.bfloat16))
    w1t = w1.T.astype(jnp.bfloat16)                               # (K, N1)
    b1r = b1.reshape(1, N1).astype(jnp.float32)
    w2t = jnp.zeros((N1, N2p), jnp.bfloat16).at[:, :N2].set(w2.T.astype(jnp.bfloat16))
    b2r = jnp.zeros((1, N2p), jnp.float32).at[:, :N2].set(b2.astype(jnp.float32))
    out = pl.pallas_call(
        _fc_head_kernel,
        out_shape=jax.ShapeDtypeStruct((Bp, N2p), jnp.float32),
        grid_spec=pltpu.PrefetchScalarGridSpec(
            num_scalar_prefetch=0,
            grid=(1,),
            in_specs=[pl.BlockSpec((Bp, K), lambda i: (0, 0)),
                      pl.BlockSpec((K, N1), lambda i: (0, 0)),
                      pl.BlockSpec((1, N1), lambda i: (0, 0)),
                      pl.BlockSpec((N1, N2p), lambda i: (0, 0)),
                      pl.BlockSpec((1, N2p), lambda i: (0, 0))],
            out_specs=pl.BlockSpec((Bp, N2p), lambda i: (0, 0)),
        ),
        compiler_params=_compiler_params(("arbitrary",)),
    )(xpad, w1t, b1r, w2t, b2r)
    return out[:B, :N2]


# ----------------------------------------------------------------------------
# Adaptive pooling glue (data-dependent prefix lengths — host-side, static Python ints)
# ----------------------------------------------------------------------------
def adaptive_avg_pool_w(xi, out_w=32):
    """xi: (H, k, C) channels-last -> (out_w, C); == nn.AdaptiveAvgPool2d((1, out_w))."""
    _, k, _ = xi.shape
    xm = jnp.mean(xi.astype(jnp.float32), axis=0)      # (k, C)
    cols = []
    for j in range(out_w):
        s = (j * k) // out_w
        e = ((j + 1) * k + out_w - 1) // out_w
        cols.append(jnp.mean(xm[s:e], axis=0))
    return jnp.stack(cols, axis=0)                     # (out_w, C)


# ----------------------------------------------------------------------------
# Parameters (resnet18 topology; random weights — see TODOs at top)
# ----------------------------------------------------------------------------
def init_params(key, num_classes=2):
    keys = iter(jax.random.split(key, 128))

    def conv_w(shape):      # kaiming-normal, fan_out, relu gain
        fan_out = shape[0] * int(np.prod(shape[2:]))
        std = float(np.sqrt(2.0 / fan_out))
        return jax.random.normal(next(keys), shape, jnp.float32) * std

    def bn(c):
        s = jnp.full((c,), 1.0 / float(np.sqrt(1.0 + _BN_EPS)), jnp.float32)
        b = jnp.zeros((c,), jnp.float32)
        return s, b

    def linear(out_f, in_f):
        bound = 1.0 / float(np.sqrt(in_f))
        w = jax.random.uniform(next(keys), (out_f, in_f), jnp.float32, -bound, bound)
        b = jax.random.uniform(next(keys), (out_f,), jnp.float32, -bound, bound)
        return w, b

    p = {}
    p['conv1_w'] = conv_w((64, 3, 7, 7))
    p['bn1_s'], p['bn1_b'] = bn(64)

    inplanes = 64
    for li, (planes, stride, nblocks) in enumerate(
            zip((64, 128, 256, 512), (1, 2, 2, 2), (2, 2, 2, 2)), start=1):
        blocks = []
        for bi in range(nblocks):
            s = stride if bi == 0 else 1
            blk = {'stride': s}
            blk['conv1_w'] = conv_w((planes, inplanes, 3, 3))
            blk['bn1_s'], blk['bn1_b'] = bn(planes)
            blk['conv2_w'] = conv_w((planes, planes, 3, 3))
            blk['bn2_s'], blk['bn2_b'] = bn(planes)
            if s != 1 or inplanes != planes:
                blk['down_w'] = conv_w((planes, inplanes, 1, 1))
                blk['down_bn_s'], blk['down_bn_b'] = bn(planes)
            inplanes = planes
            blocks.append(blk)
        p[f'layer{li}'] = blocks

    p['c1d_w1'] = conv_w((1024, 512, 5))          # Conv1d(512, 1024, 5, 2, 1)
    p['bn1d_s'], p['bn1d_b'] = bn(1024)
    p['c1d_w2'] = conv_w((2048, 1024, 3))         # Conv1d(1024, 2048, 3, 1, 1)
    p['fc1_w'], p['fc1_b'] = linear(256, 2048)
    p['fc2_w'], p['fc2_b'] = linear(num_classes, 256)
    return p


# ----------------------------------------------------------------------------
# Forward pass
# ----------------------------------------------------------------------------
def basic_block(x, blk):
    s = blk['stride']
    out = conv2d_fused(x, blk['conv1_w'], (s, s), (1, 1),
                       scale=blk['bn1_s'], bias=blk['bn1_b'], relu=True)
    if 'down_w' in blk:
        identity = conv2d_fused(x, blk['down_w'], (s, s), (0, 0),
                                scale=blk['down_bn_s'], bias=blk['down_bn_b'],
                                relu=False)
    else:
        identity = x
    # conv2 + bn2 + residual-add + ReLU fused into a single kernel epilogue.
    return conv2d_fused(out, blk['conv2_w'], (1, 1), (1, 1),
                        scale=blk['bn2_s'], bias=blk['bn2_b'], relu=True,
                        residual=identity)


def forward(params, x_nchw, bz):
    """x_nchw: (B, 3, H, W) f32 (PyTorch layout); bz: python list of floats, len B."""
    # single layout change; everything downstream stays channels-last and bf16.
    x = jnp.transpose(x_nchw, (0, 2, 3, 1)).astype(jnp.bfloat16)

    x = conv2d_stem(x, params['conv1_w'], (2, 2), (3, 3),
                    scale=params['bn1_s'], bias=params['bn1_b'], relu=True)
    x = maxpool2d(x, kernel=3, stride=2, padding=1)

    for li in range(1, 5):
        for blk in params[f'layer{li}']:
            x = basic_block(x, blk)

    B, H4, W4, C = x.shape
    # feature1[i] = AdaptiveAvgPool2d((1, 32)) over the width prefix int(W4 * bz[i]).
    pooled = []
    for i in range(B):
        k = int(W4 * bz[i])
        assert k >= 32, "reference semantics require int(W * bz[i]) >= 32"
        pooled.append(adaptive_avg_pool_w(x[i, :, :k, :], 32))
    pooled = jnp.stack(pooled, axis=0)                     # (B, 32, 512) channels-last

    y = conv1d_fused(pooled.astype(jnp.bfloat16), params['c1d_w1'], stride=2,
                     padding=1, scale=params['bn1d_s'], bias=params['bn1d_b'],
                     relu=True)
    y = conv1d_fused(y, params['c1d_w2'], stride=1, padding=1)

    L = y.shape[1]
    feats = []
    for i in range(B):
        k = int(L * bz[i])
        assert k >= 1
        feats.append(jnp.mean(y[i, :k, :].astype(jnp.float32), axis=0))   # AdaptiveAvgPool1d(1)
    feats = jnp.stack(feats, axis=0)                       # (B, 2048)

    return fc_head(feats, params['fc1_w'], params['fc1_b'],
                   params['fc2_w'], params['fc2_b'])       # (B, num_classes)


if __name__ == "__main__":
    key = jax.random.PRNGKey(0)
    pkey, xkey = jax.random.split(key)
    params = init_params(pkey, num_classes=2)

    # Width chosen so layer4 output width = 36 and int(W4 * bz[i]) >= 32, which the
    # reference's feature1 assignment requires; H=4 keeps the test small.
    x = jax.random.normal(xkey, (2, 3, 4, 1152), jnp.float32)
    bz = [1.0, 0.9]

    out = forward(params, x, bz)
    out = jax.block_until_ready(out)
    assert out.shape == (2, 2)
    assert bool(jnp.all(jnp.isfinite(out)))
    print("KERNEL_OK")
</pallas_src>

<mosaic_0001>
module attributes {stable_mosaic.version = 11 : i64} {
  func.func @kernel(%arg0: i32, %arg1: i32, %arg2: memref<1x2x576x147xbf16, #tpu.memory_space<vmem>>, %arg3: memref<1x1x147x64xbf16, #tpu.memory_space<vmem>>, %arg4: memref<1x64xf32, #tpu.memory_space<vmem>>, %arg5: memref<1x64xf32, #tpu.memory_space<vmem>>, %arg6: memref<1x2x576x64xbf16, #tpu.memory_space<vmem>>) attributes {dimension_semantics = [#tpu.dimension_semantics<parallel>, #tpu.dimension_semantics<parallel>], iteration_bounds = array<i64: 2, 1>, scalar_prefetch = 0 : i64, scratch_operands = 0 : i64, tpu.core_type = #tpu.core_type<tc>, window_params = [{transform_indices = @transform_0, window_bounds = array<i64: 1, 2, 576, 147>}, {transform_indices = @transform_1, window_bounds = array<i64: 1, 1, 147, 64>}, {transform_indices = @transform_2, window_bounds = array<i64: 1, 64>}, {transform_indices = @transform_3, window_bounds = array<i64: 1, 64>}, {transform_indices = @transform_4, window_bounds = array<i64: 1, 2, 576, 64>}]} {
    %c0 = arith.constant 0 : index
    %c0_0 = arith.constant 0 : index
    %0 = vector.load %arg4[%c0, %c0_0] : memref<1x64xf32, #tpu.memory_space<vmem>>, vector<1x64xf32>
    %c0_1 = arith.constant 0 : index
    %c0_2 = arith.constant 0 : index
    %1 = vector.load %arg5[%c0_1, %c0_2] : memref<1x64xf32, #tpu.memory_space<vmem>>, vector<1x64xf32>
    %c0_3 = arith.constant 0 : index
    %c0_4 = arith.constant 0 : index
    %c0_5 = arith.constant 0 : index
    %c0_6 = arith.constant 0 : index
    %2 = vector.load %arg2[%c0_3, %c0_4, %c0_5, %c0_6] : memref<1x2x576x147xbf16, #tpu.memory_space<vmem>>, vector<1x1x576x147xbf16>
    %3 = vector.shape_cast %2 : vector<1x1x576x147xbf16> to vector<576x147xbf16>
    %c0_7 = arith.constant 0 : index
    %c0_8 = arith.constant 0 : index
    %c0_9 = arith.constant 0 : index
    %c0_10 = arith.constant 0 : index
    %4 = vector.load %arg3[%c0_7, %c0_8, %c0_9, %c0_10] : memref<1x1x147x64xbf16, #tpu.memory_space<vmem>>, vector<1x1x147x64xbf16>
    %5 = vector.shape_cast %4 : vector<1x1x147x64xbf16> to vector<147x64xbf16>
    %cst = arith.constant dense<0.000000e+00> : vector<576x64xf32>
    %6 = tpu.matmul %3, %5, %cst {dimension_numbers = #tpu.dot_dimension_numbers<[1], [0], [0], [1], [0, 0, 1, 1], [], []>} : vector<576x147xbf16>, vector<147x64xbf16>, vector<576x64xf32> -> vector<576x64xf32>
    %7 = vector.broadcast %0 : vector<1x64xf32> to vector<576x64xf32>
    %8 = arith.mulf %6, %7 : vector<576x64xf32>
    %9 = vector.broadcast %1 : vector<1x64xf32> to vector<576x64xf32>
    %10 = arith.addf %8, %9 : vector<576x64xf32>
    %cst_11 = arith.constant 0.000000e+00 : f32
    %11 = vector.broadcast %cst_11 : f32 to vector<576x64xf32>
    %12 = arith.maximumf %10, %11 : vector<576x64xf32>
    %13 = arith.truncf %12 : vector<576x64xf32> to vector<576x64xbf16>
    %c0_12 = arith.constant 0 : index
    %c0_13 = arith.constant 0 : index
    %c0_14 = arith.constant 0 : index
    %c0_15 = arith.constant 0 : index
    %14 = vector.load %arg6[%c0_12, %c0_13, %c0_14, %c0_15] : memref<1x2x576x64xbf16, #tpu.memory_space<vmem>>, vector<1x1x576x64xbf16>
    %15 = vector.shape_cast %14 : vector<1x1x576x64xbf16> to vector<576x64xbf16>
    %16 = vector.shape_cast %13 : vector<576x64xbf16> to vector<1x1x576x64xbf16>
    tpu.vector_store %arg6[%c0_12, %c0_13, %c0_14, %c0_15], %16 {strides = array<i32>} : memref<1x2x576x64xbf16, #tpu.memory_space<vmem>>, vector<1x1x576x64xbf16>,
    %c0_16 = arith.constant 0 : index
    %c1 = arith.constant 1 : index
    %c0_17 = arith.constant 0 : index
    %c0_18 = arith.constant 0 : index
    %17 = vector.load %arg2[%c0_16, %c1, %c0_17, %c0_18] : memref<1x2x576x147xbf16, #tpu.memory_space<vmem>>, vector<1x1x576x147xbf16>
    %18 = vector.shape_cast %17 : vector<1x1x576x147xbf16> to vector<576x147xbf16>
    %c0_19 = arith.constant 0 : index
    %c0_20 = arith.constant 0 : index
    %c0_21 = arith.constant 0 : index
    %c0_22 = arith.constant 0 : index
    %19 = vector.load %arg3[%c0_19, %c0_20, %c0_21, %c0_22] : memref<1x1x147x64xbf16, #tpu.memory_space<vmem>>, vector<1x1x147x64xbf16>
    %20 = vector.shape_cast %19 : vector<1x1x147x64xbf16> to vector<147x64xbf16>
    %cst_23 = arith.constant dense<0.000000e+00> : vector<576x64xf32>
    %21 = tpu.matmul %18, %20, %cst_23 {dimension_numbers = #tpu.dot_dimension_numbers<[1], [0], [0], [1], [0, 0, 1, 1], [], []>} : vector<576x147xbf16>, vector<147x64xbf16>, vector<576x64xf32> -> vector<576x64xf32>
    %22 = vector.broadcast %0 : vector<1x64xf32> to vector<576x64xf32>
    %23 = arith.mulf %21, %22 : vector<576x64xf32>
    %24 = vector.broadcast %1 : vector<1x64xf32> to vector<576x64xf32>
    %25 = arith.addf %23, %24 : vector<576x64xf32>
    %cst_24 = arith.constant 0.000000e+00 : f32
    %26 = vector.broadcast %cst_24 : f32 to vector<576x64xf32>
    %27 = arith.maximumf %25, %26 : vector<576x64xf32>
    %28 = arith.truncf %27 : vector<576x64xf32> to vector<576x64xbf16>
    %c0_25 = arith.constant 0 : index
    %c1_26 = arith.constant 1 : index
    %c0_27 = arith.constant 0 : index
    %c0_28 = arith.constant 0 : index
    %29 = vector.load %arg6[%c0_25, %c1_26, %c0_27, %c0_28] : memref<1x2x576x64xbf16, #tpu.memory_space<vmem>>, vector<1x1x576x64xbf16>
    %30 = vector.shape_cast %29 : vector<1x1x576x64xbf16> to vector<576x64xbf16>
    %31 = vector.shape_cast %28 : vector<576x64xbf16> to vector<1x1x576x64xbf16>
    tpu.vector_store %arg6[%c0_25, %c1_26, %c0_27, %c0_28], %31 {strides = array<i32>} : memref<1x2x576x64xbf16, #tpu.memory_space<vmem>>, vector<1x1x576x64xbf16>,
    return
  }
  func.func @transform_0(%arg0: i32, %arg1: i32) -> (i32, i32, i32, i32) {
    %c0_i32 = arith.constant 0 : i32
    %c0_i32_0 = arith.constant 0 : i32
    %c0_i32_1 = arith.constant 0 : i32
    %c0_i32_2 = arith.constant 0 : i32
    return %arg0, %c0_i32, %c0_i32_0, %c0_i32_1 : i32, i32, i32, i32
  }
  func.func @transform_1(%arg0: i32, %arg1: i32) -> (i32, i32, i32, i32) {
    %c0_i32 = arith.constant 0 : i32
    %c0_i32_0 = arith.constant 0 : i32
    %c0_i32_1 = arith.constant 0 : i32
    %c0_i32_2 = arith.constant 0 : i32
    return %c0_i32, %c0_i32_0, %c0_i32_1, %arg1 : i32, i32, i32, i32
  }
  func.func @transform_2(%arg0: i32, %arg1: i32) -> (i32, i32) {
    %c0_i32 = arith.constant 0 : i32
    %c0_i32_0 = arith.constant 0 : i32
    return %c0_i32, %arg1 : i32, i32
  }
  func.func @transform_3(%arg0: i32, %arg1: i32) -> (i32, i32) {
    %c0_i32 = arith.constant 0 : i32
    %c0_i32_0 = arith.constant 0 : i32
    return %c0_i32, %arg1 : i32, i32
  }
  func.func @transform_4(%arg0: i32, %arg1: i32) -> (i32, i32, i32, i32) {
    %c0_i32 = arith.constant 0 : i32
    %c0_i32_0 = arith.constant 0 : i32
    %c0_i32_1 = arith.constant 0 : i32
    return %arg0, %c0_i32, %c0_i32_0, %arg1 : i32, i32, i32, i32
  }
}

</mosaic_0001>

<bundles_post_ra>
// kernel: tpu_custom_call.1
= control target key start
LH: loop header
LB: loop body
LE: loop exit
PB: predicated region body
PF: predicated region fallthrough
CT: control target
= control target key end

     0   :  { %s4340_s15 = smov 0   ;;  %s4342_s16 = smov 0   ;;  %s5307_s0 = inlined_call_operand.vmem [shape: bf16[2,2,576,147], index: 0, kind: input, shape index: {}]   ;;  %s5308_s1 = inlined_call_operand.vmem [shape: bf16[1,1,147,64], index: 1, kind: input, shape index: {}]   ;;  %s5309_s2 = inlined_call_operand.vmem [shape: f32[1,64], index: 2, kind: input, shape index: {}]   ;;  %s5310_s3 = inlined_call_operand.vmem [shape: f32[1,64], index: 3, kind: input, shape index: {}]   ;;  %s5311_s4 = inlined_call_operand.vmem [shape: bf16[2,2,576,64], index: 4, kind: output, shape index: {}]  }
   0x1   :  { %s4344_s17 = smov 0  }
   0x2 LB: > { %s26_s18 = sadd.s32 1, %s4307_s16  ;;  %p3370_p0 = scmp.ge.s32.totalorder %s4311_s17, 1  ;;  %s4311_s17 = sphi %s4344_s17, %s14_s17   ;;  %s4307_s16 = sphi %s4342_s16, %s5313_s16   ;;  %s4303_s15 = sphi %s4340_s15, %s5312_s15  }
   0x3   : > { %p28_p1 = scmp.ge.s32.totalorder %s26_s18, 2  ;;  %p201_p2 = scmp.lt.s32.totalorder %s4311_s17, 3 }
   0x5   : > { %s5315_s18 = smov (%p28_p1, %s26_s18), 0  ;;  %p202_p3 = pnand %p3370_p0, %p201_p2 }
   0x6   : > { %p240_p4 = scmp.lt.s32.totalorder (!%p202_p3), %s4303_s15, 1 }
   0x7   : > { %205 = sbr.rel (%p202_p3) target bundleno = 539 (0x21b), region = 36 }
   0xc   : > { %v4073_v0 = vld [vmem:[%s5308_s1 + $0x38] sm:$0xff]   ;;  %v4313_v1 = vmov 0   ;;  %v4075_v3 = vld [vmem:[%s5308_s1 + $0x30] sm:$0xff]   ;;  %v4077_v5 = vld [vmem:[%s5308_s1 + $0x28] sm:$0xff]   ;;  %s5317_s15 = smov (!%p240_p4, %s4303_s15), 1  ;;  %vm738_vm0 = vcmask 154624  }
   0xd   : > { %854 = vmatprep.subr.bf16.mxu0 %v4313_v1  ;;  %2348 = vmatprep.subr.bf16.mxu1 %v4313_v1  ;;  %v4074_v2 = vld [vmem:[%s5308_s1 + $0x38] sm:$0xff]   ;;  %v4076_v4 = vld [vmem:[%s5308_s1 + $0x30] sm:$0xff]   ;;  %v4078_v6 = vld [vmem:[%s5308_s1 + $0x28] sm:$0xff]   ;;  %s4045_s9 = smul.u32 1152, %s5317_s15  ;;  %vm847_vm1 = vcmask 1040384   ;;  %vm848_vm2 = vcmask 1041408  }
   0xe   : > { %855 = vmatpush1.bf16.msra.mxu0 %v4073_v0  ;;  %2349 = vmatpush1.bf16.msra.mxu1 %v4074_v2  ;;  %v4079_v7 = vld [vmem:[%s5308_s1 + $0x20] sm:$0xff]   ;;  %v4081_v9 = vld [vmem:[%s5308_s1 + $0x18] sm:$0xff]   ;;  %v4083_v11 = vld [vmem:[%s5308_s1 + $0x10] sm:$0xff]   ;;  %v4314_v17 = vmov 65535   ;;  %s4046_s23 = smul.u32 576, %s5317_s15  ;;  %vm1691_vm3 = vcmask 519168  }
   0xf   : > { %856 = vmatprep.subr.bf16.mxu0 %v4313_v1  ;;  %2350 = vmatprep.subr.bf16.mxu1 %v4313_v1  ;;  %v4080_v8 = vld [vmem:[%s5308_s1 + $0x20] sm:$0xff]   ;;  %v4082_v10 = vld [vmem:[%s5308_s1 + $0x18] sm:$0xff]   ;;  %v4084_v12 = vld [vmem:[%s5308_s1 + $0x10] sm:$0xff]   ;;  %s4410_s24 = scalar_lea.vmem %s5307_s0, %s4045_s9  ;;  %v849_v18 = vsel %vm847_vm1, 4294967295, %v4314_v17 }
  0x10   : > { %v4095_v13 = vld [vmem:[%s4410_s24 + $0x4] ss:$8 sps:$4 sm:$0xff]   ;;  %v4089_v21 = vld [vmem:[%s5308_s1 + $0x48] ss:$0 sps:$4 sm:$0x33]   ;;  %v850_v22 = vsel %vm848_vm2, %v849_v18, 0  ;;  %s4626_s26 = scalar_lea.vmem %s5311_s4, %s4046_s23 }
  0x11   : > { %v4098_v14 = vld [vmem:[%s4410_s24 + $0x244] ss:$8 sps:$4 sm:$0xff]   ;;  %3455 = vmatprep.mubr.msk.bf16.mxu0 %vm738_vm0, %v4095_v13  ;;  %v4090_v23 = vld [vmem:[%s5308_s1 + $0x48] ss:$0 sps:$4 sm:$0x33]   ;;  %v852_v24 = vand.u32 %v4089_v21, %v850_v22 }
  0x12   : > { %857 = vmatpush1.bf16.msra.mxu0 %v4075_v3  ;;  %2351 = vmatpush1.bf16.msra.mxu1 %v4076_v4  ;;  %v4085_v15 = vld [vmem:[%s5308_s1 + $0x8] sm:$0xff]   ;;  %v4087_v19 = vld [vmem:[%s5308_s1] sm:$0xff]   ;;  %v2346_v25 = vand.u32 %v4090_v23, %v850_v22  ;;  %v4099_v30 = vld [vmem:[%s4410_s24 + $0x14] ss:$8 sps:$4 sm:$0xff]  }
  0x13   : > { %858 = vmatprep.subr.bf16.mxu0 %v4313_v1  ;;  %2352 = vmatprep.subr.bf16.mxu1 %v4313_v1  ;;  %v4086_v16 = vld [vmem:[%s5308_s1 + $0x8] sm:$0xff]   ;;  %v4088_v20 = vld [vmem:[%s5308_s1] sm:$0xff]   ;;  %v4101_v31 = vld [vmem:[%s4410_s24 + $0x254] ss:$8 sps:$4 sm:$0xff]  }
  0x14   : > { %3719 = vmatprep.mubr.msk.bf16.mxu1 %vm738_vm0, %v4098_v14  ;;  %v4091_v26 = vld [vmem:[%s5308_s1 + $0x40] sm:$0xff]   ;;  %v4103_v32 = vld [vmem:[%s4410_s24 + $0x10] ss:$8 sps:$4 sm:$0xff]   ;;  %v4111_v38 = vld [vmem:[%s4410_s24 + $0x34] ss:$8 sps:$4 sm:$0xff]  }
  0x15   : > { %v4092_v27 = vld [vmem:[%s5308_s1 + $0x40] sm:$0xff]   ;;  %v4104_v33 = vld [vmem:[%s4410_s24 + $0x250] ss:$8 sps:$4 sm:$0xff]   ;;  %v4113_v39 = vld [vmem:[%s4410_s24 + $0x274] ss:$8 sps:$4 sm:$0xff]  }
  0x16   : > { %859 = vmatpush1.bf16.msra.mxu0 %v4077_v5  ;;  %2353 = vmatpush1.bf16.msra.mxu1 %v4078_v6  ;;  %v4093_v28 = vld [vmem:[%s4410_s24] ss:$8 sps:$4 sm:$0xff]   ;;  %v4105_v34 = vld [vmem:[%s4410_s24 + $0x24] ss:$8 sps:$4 sm:$0xff]   ;;  %v4115_v40 = vld [vmem:[%s4410_s24 + $0x30] ss:$8 sps:$4 sm:$0xff]  }
  0x17   : > { %860 = vmatprep.subr.bf16.mxu0 %v4313_v1  ;;  %2354 = vmatprep.subr.bf16.mxu1 %v4313_v1  ;;  %v4096_v29 = vld [vmem:[%s4410_s24 + $0x240] ss:$8 sps:$4 sm:$0xff]   ;;  %v4107_v35 = vld [vmem:[%s4410_s24 + $0x264] ss:$8 sps:$4 sm:$0xff]   ;;  %v4116_v41 = vld [vmem:[%s4410_s24 + $0x270] ss:$8 sps:$4 sm:$0xff]  }
  0x18   : > { %v4109_v36 = vld [vmem:[%s4410_s24 + $0x20] ss:$8 sps:$4 sm:$0xff]   ;;  %v4117_v42 = vld [vmem:[%s4410_s24 + $0x44] ss:$8 sps:$4 sm:$0xff]   ;;  %v4123_v46 = vld [vmem:[%s4410_s24 + $0x54] ss:$8 sps:$4 sm:$0xff]  }
  0x19   : > { %v4110_v37 = vld [vmem:[%s4410_s24 + $0x260] ss:$8 sps:$4 sm:$0xff]   ;;  %v4119_v43 = vld [vmem:[%s4410_s24 + $0x284] ss:$8 sps:$4 sm:$0xff]   ;;  %v4125_v47 = vld [vmem:[%s4410_s24 + $0x294] ss:$8 sps:$4 sm:$0xff]  }
  0x1a   : > { %861 = vmatpush1.bf16.msra.mxu0 %v4079_v7  ;;  %2355 = vmatpush1.bf16.msra.mxu1 %v4080_v8  ;;  %v4121_v44 = vld [vmem:[%s4410_s24 + $0x40] ss:$8 sps:$4 sm:$0xff]   ;;  %v4127_v48 = vld [vmem:[%s4410_s24 + $0x50] ss:$8 sps:$4 sm:$0xff]   ;;  %v4129_v50 = vld [vmem:[%s4410_s24 + $0x64] ss:$8 sps:$4 sm:$0xff]  }
  0x1b   : > { %862 = vmatprep.subr.bf16.mxu0 %v4313_v1  ;;  %2356 = vmatprep.subr.bf16.mxu1 %v4313_v1  ;;  %v4122_v45 = vld [vmem:[%s4410_s24 + $0x280] ss:$8 sps:$4 sm:$0xff]   ;;  %v4128_v49 = vld [vmem:[%s4410_s24 + $0x290] ss:$8 sps:$4 sm:$0xff]   ;;  %v4131_v51 = vld [vmem:[%s4410_s24 + $0x2a4] ss:$8 sps:$4 sm:$0xff]  }
  0x1c   : > { %v4133_v52 = vld [vmem:[%s4410_s24 + $0x60] ss:$8 sps:$4 sm:$0xff]   ;;  %v4135_v54 = vld [vmem:[%s4410_s24 + $0x74] ss:$8 sps:$4 sm:$0xff]   ;;  %v4139_v56 = vld [vmem:[%s4410_s24 + $0x70] ss:$8 sps:$4 sm:$0xff]  }
  0x1d   : > { %v4134_v53 = vld [vmem:[%s4410_s24 + $0x2a0] ss:$8 sps:$4 sm:$0xff]   ;;  %v4137_v55 = vld [vmem:[%s4410_s24 + $0x2b4] ss:$8 sps:$4 sm:$0xff]   ;;  %v4140_v57 = vld [vmem:[%s4410_s24 + $0x2b0] ss:$8 sps:$4 sm:$0xff]  }
  0x1e   : > { %863 = vmatpush1.bf16.msra.mxu0 %v4081_v9  ;;  %2357 = vmatpush1.bf16.msra.mxu1 %v4082_v10  ;;  %v4141_v58 = vld [vmem:[%s4410_s24 + $0x84] ss:$8 sps:$4 sm:$0xff]   ;;  %v4145_v60 = vld [vmem:[%s4410_s24 + $0x80] ss:$8 sps:$4 sm:$0xff]   ;;  %v4147_v62 = vld [vmem:[%s4410_s24 + $0x94] ss:$8 sps:$4 sm:$0xff]  }
  0x1f   : > { %864 = vmatprep.subr.bf16.mxu0 %v4313_v1  ;;  %2358 = vmatprep.subr.bf16.mxu1 %v4313_v1  ;;  %v4143_v59 = vld [vmem:[%s4410_s24 + $0x2c4] ss:$8 sps:$4 sm:$0xff]   ;;  %v4146_v61 = vld [vmem:[%s4410_s24 + $0x2c0] ss:$8 sps:$4 sm:$0xff]   ;;  %v4149_v63 = vld [vmem:[%s4410_s24 + $0x2d4] ss:$8 sps:$4 sm:$0xff]  }
  0x20   : > { %v4151_v0 = vld [vmem:[%s4410_s24 + $0x90] ss:$8 sps:$4 sm:$0xff]   ;;  %v4153_v2 = vld [vmem:[%s4410_s24 + $0xa4] ss:$8 sps:$4 sm:$0xff]   ;;  %v4157_v4 = vld [vmem:[%s4410_s24 + $0xa0] ss:$8 sps:$4 sm:$0xff]  }
  0x21   : > { %v4155_v3 = vld [vmem:[%s4410_s24 + $0x2e4] ss:$8 sps:$4 sm:$0xff]   ;;  %v4158_v5 = vld [vmem:[%s4410_s24 + $0x2e0] ss:$8 sps:$4 sm:$0xff]   ;;  %v4159_v6 = vld [vmem:[%s4410_s24 + $0xb4] ss:$8 sps:$4 sm:$0xff]  }
  0x22   : > { %865 = vmatpush1.bf16.msra.mxu0 %v4083_v11  ;;  %2359 = vmatpush1.bf16.msra.mxu1 %v4084_v12  ;;  %v4161_v7 = vld [vmem:[%s4410_s24 + $0x2f4] ss:$8 sps:$4 sm:$0xff]   ;;  %v4163_v8 = vld [vmem:[%s4410_s24 + $0xb0] ss:$8 sps:$4 sm:$0xff]   ;;  %v4165_v10 = vld [vmem:[%s4410_s24 + $0xc4] ss:$8 sps:$4 sm:$0xff]  }
  0x23   : > { %866 = vmatprep.subr.bf16.mxu0 %v4313_v1  ;;  %2360 = vmatprep.subr.bf16.mxu1 %v4313_v1  ;;  %v4164_v9 = vld [vmem:[%s4410_s24 + $0x2f0] ss:$8 sps:$4 sm:$0xff]   ;;  %v4167_v11 = vld [vmem:[%s4410_s24 + $0x304] ss:$8 sps:$4 sm:$0xff]   ;;  %v4169_v12 = vld [vmem:[%s4410_s24 + $0xc0] ss:$8 sps:$4 sm:$0xff]  }
  0x24   : > { %v4170_v13 = vld [vmem:[%s4410_s24 + $0x300] ss:$8 sps:$4 sm:$0xff]   ;;  %v4171_v14 = vld [vmem:[%s4410_s24 + $0xd4] ss:$8 sps:$4 sm:$0xff]   ;;  %v4176_v17 = vld [vmem:[%s4410_s24 + $0x310] ss:$8 sps:$4 sm:$0xff]  }
  0x25   : > { %v4177_v18 = vld [vmem:[%s4410_s24 + $0xe4] ss:$8 sps:$4 sm:$0xff]   ;;  %v4182_v21 = vld [vmem:[%s4410_s24 + $0x320] ss:$8 sps:$4 sm:$0xff]   ;;  %v4183_v22 = vld [vmem:[%s4410_s24 + $0xf4] ss:$8 sps:$4 sm:$0xff]  }
  0x26   : > { %867 = vmatpush1.bf16.msra.mxu0 %v4085_v15  ;;  %2361 = vmatpush1.bf16.msra.mxu1 %v4086_v16  ;;  %v4173_v15 = vld [vmem:[%s4410_s24 + $0x314] ss:$8 sps:$4 sm:$0xff]   ;;  %v4175_v16 = vld [vmem:[%s4410_s24 + $0xd0] ss:$8 sps:$4 sm:$0xff]  }
  0x27   : > { %868 = vmatprep.subr.bf16.mxu0 %v4313_v1  ;;  %2362 = vmatprep.subr.bf16.mxu1 %v4313_v1  ;;  %v4185_v23 = vld [vmem:[%s4410_s24 + $0x334] ss:$8 sps:$4 sm:$0xff]  }
  0x2a   : > { %869 = vmatpush1.bf16.msra.mxu0 %v4087_v19  ;;  %2363 = vmatpush1.bf16.msra.mxu1 %v4088_v20  ;;  %v4179_v19 = vld [vmem:[%s4410_s24 + $0x324] ss:$8 sps:$4 sm:$0xff]   ;;  %v4181_v20 = vld [vmem:[%s4410_s24 + $0xe0] ss:$8 sps:$4 sm:$0xff]  }
  0x2b   : > { %882 = vmatprep.subr.bf16.mxu0 %v4313_v1  ;;  %2376 = vmatprep.subr.bf16.mxu1 %v4313_v1 }
  0x2e   : > { %883 = vmatpush2.bf16.msra.mxu0 %v852_v24  ;;  %2377 = vmatpush2.bf16.msra.mxu1 %v2346_v25  ;;  %v4187_v24 = vld [vmem:[%s4410_s24 + $0xf0] ss:$8 sps:$4 sm:$0xff]  }
  0x2f   : > { %884 = vmatprep.subr.bf16.mxu0 %v4313_v1  ;;  %2378 = vmatprep.subr.bf16.mxu1 %v4313_v1  ;;  %v4152_v1 = vld [vmem:[%s4410_s24 + $0x2d0] ss:$8 sps:$4 sm:$0xff]  }
  0x30   : > { %v4188_v25 = vld [vmem:[%s4410_s24 + $0x330] ss:$8 sps:$4 sm:$0xff]  }
  0x32   : > { %885 = vmatpush2.bf16.msra.mxu0 %v4091_v26  ;;  %2379 = vmatpush2.bf16.msra.mxu1 %v4092_v27  ;;  %v4189_v26 = vld [vmem:[%s4410_s24 + $0x104] ss:$8 sps:$4 sm:$0xff]  }
  0x33   : > { %v4191_v27 = vld [vmem:[%s4410_s24 + $0x344] ss:$8 sps:$4 sm:$0xff]  }
  0x35   : > { %887 = vmatmul.mubr.bf16.vlgmr.msra.gmra.mxu0 %v4093_v28  ;;  %2381 = vmatmul.mubr.bf16.vlgmr.msra.gmra.mxu1 %v4096_v29  ;;  %v4193_v28 = vld [vmem:[%s4410_s24 + $0x100] ss:$8 sps:$4 sm:$0xff]  }
  0x36   : > { %3456 = vmatprep.mubr.msk.bf16.mxu0 %vm738_vm0, %v4099_v30  ;;  %3720 = vmatprep.mubr.msk.bf16.mxu1 %vm738_vm0, %v4101_v31  ;;  %v4194_v29 = vld [vmem:[%s4410_s24 + $0x340] ss:$8 sps:$4 sm:$0xff]   ;;  %v4195_v30 = vld [vmem:[%s4410_s24 + $0x114] ss:$8 sps:$4 sm:$0xff]  }
  0x37   : > { %v4197_v31 = vld [vmem:[%s4410_s24 + $0x354] ss:$8 sps:$4 sm:$0xff]  }
  0x3d   : > { %895 = vmatmul.mubr.bf16.gmra.mxu0 %v4103_v32  ;;  %2389 = vmatmul.mubr.bf16.gmra.mxu1 %v4104_v33  ;;  %v4199_v32 = vld [vmem:[%s4410_s24 + $0x110] ss:$8 sps:$4 sm:$0xff]  }
  0x3e   : > { %3457 = vmatprep.mubr.msk.bf16.mxu0 %vm738_vm0, %v4105_v34  ;;  %3721 = vmatprep.mubr.msk.bf16.mxu1 %vm738_vm0, %v4107_v35  ;;  %v4200_v33 = vld [vmem:[%s4410_s24 + $0x350] ss:$8 sps:$4 sm:$0xff]   ;;  %v4201_v34 = vld [vmem:[%s4410_s24 + $0x124] ss:$8 sps:$4 sm:$0xff]  }
  0x3f   : > { %v4203_v35 = vld [vmem:[%s4410_s24 + $0x364] ss:$8 sps:$4 sm:$0xff]  }
  0x45   : > { %903 = vmatmul.mubr.bf16.gmra.mxu0 %v4109_v36  ;;  %2397 = vmatmul.mubr.bf16.gmra.mxu1 %v4110_v37  ;;  %v4205_v36 = vld [vmem:[%s4410_s24 + $0x120] ss:$8 sps:$4 sm:$0xff]  }
  0x46   : > { %3458 = vmatprep.mubr.msk.bf16.mxu0 %vm738_vm0, %v4111_v38  ;;  %3722 = vmatprep.mubr.msk.bf16.mxu1 %vm738_vm0, %v4113_v39  ;;  %v4206_v37 = vld [vmem:[%s4410_s24 + $0x360] ss:$8 sps:$4 sm:$0xff]   ;;  %v4207_v38 = vld [vmem:[%s4410_s24 + $0x134] ss:$8 sps:$4 sm:$0xff]  }
  0x47   : > { %v4209_v39 = vld [vmem:[%s4410_s24 + $0x374] ss:$8 sps:$4 sm:$0xff]  }
  0x4d   : > { %911 = vmatmul.mubr.bf16.gmra.mxu0 %v4115_v40  ;;  %2405 = vmatmul.mubr.bf16.gmra.mxu1 %v4116_v41  ;;  %v4211_v40 = vld [vmem:[%s4410_s24 + $0x130] ss:$8 sps:$4 sm:$0xff]  }
  0x4e   : > { %3459 = vmatprep.mubr.msk.bf16.mxu0 %vm738_vm0, %v4117_v42  ;;  %3723 = vmatprep.mubr.msk.bf16.mxu1 %vm738_vm0, %v4119_v43  ;;  %v4212_v41 = vld [vmem:[%s4410_s24 + $0x370] ss:$8 sps:$4 sm:$0xff]   ;;  %v4213_v42 = vld [vmem:[%s4410_s24 + $0x144] ss:$8 sps:$4 sm:$0xff]  }
  0x4f   : > { %v4215_v43 = vld [vmem:[%s4410_s24 + $0x384] ss:$8 sps:$4 sm:$0xff]  }
  0x55   : > { %919 = vmatmul.mubr.bf16.gmra.mxu0 %v4121_v44  ;;  %2413 = vmatmul.mubr.bf16.gmra.mxu1 %v4122_v45  ;;  %v4217_v44 = vld [vmem:[%s4410_s24 + $0x140] ss:$8 sps:$4 sm:$0xff]  }
  0x56   : > { %3460 = vmatprep.mubr.msk.bf16.mxu0 %vm738_vm0, %v4123_v46  ;;  %3724 = vmatprep.mubr.msk.bf16.mxu1 %vm738_vm0, %v4125_v47  ;;  %v4218_v45 = vld [vmem:[%s4410_s24 + $0x380] ss:$8 sps:$4 sm:$0xff]   ;;  %v4219_v46 = vld [vmem:[%s4410_s24 + $0x154] ss:$8 sps:$4 sm:$0xff]  }
  0x57   : > { %v4221_v47 = vld [vmem:[%s4410_s24 + $0x394] ss:$8 sps:$4 sm:$0xff]  }
  0x5d   : > { %927 = vmatmul.mubr.bf16.gmra.mxu0 %v4127_v48  ;;  %2421 = vmatmul.mubr.bf16.gmra.mxu1 %v4128_v49  ;;  %v4223_v48 = vld [vmem:[%s4410_s24 + $0x150] ss:$8 sps:$4 sm:$0xff]  }
  0x5e   : > { %3461 = vmatprep.mubr.msk.bf16.mxu0 %vm738_vm0, %v4129_v50  ;;  %3725 = vmatprep.mubr.msk.bf16.mxu1 %vm738_vm0, %v4131_v51  ;;  %v4224_v49 = vld [vmem:[%s4410_s24 + $0x390] ss:$8 sps:$4 sm:$0xff]   ;;  %v4225_v50 = vld [vmem:[%s4410_s24 + $0x164] ss:$8 sps:$4 sm:$0xff]  }
  0x5f   : > { %v4227_v51 = vld [vmem:[%s4410_s24 + $0x3a4] ss:$8 sps:$4 sm:$0xff]  }
  0x65   : > { %935 = vmatmul.mubr.bf16.gmra.mxu0 %v4133_v52  ;;  %2429 = vmatmul.mubr.bf16.gmra.mxu1 %v4134_v53  ;;  %v4229_v52 = vld [vmem:[%s4410_s24 + $0x160] ss:$8 sps:$4 sm:$0xff]  }
  0x66   : > { %3462 = vmatprep.mubr.msk.bf16.mxu0 %vm738_vm0, %v4135_v54  ;;  %3726 = vmatprep.mubr.msk.bf16.mxu1 %vm738_vm0, %v4137_v55  ;;  %v4230_v53 = vld [vmem:[%s4410_s24 + $0x3a0] ss:$8 sps:$4 sm:$0xff]   ;;  %v4231_v54 = vld [vmem:[%s4410_s24 + $0x174] ss:$8 sps:$4 sm:$0xff]  }
  0x67   : > { %v4233_v55 = vld [vmem:[%s4410_s24 + $0x3b4] ss:$8 sps:$4 sm:$0xff]  }
  0x6d   : > { %943 = vmatmul.mubr.bf16.gmra.mxu0 %v4139_v56  ;;  %2437 = vmatmul.mubr.bf16.gmra.mxu1 %v4140_v57  ;;  %v4235_v56 = vld [vmem:[%s4410_s24 + $0x170] ss:$8 sps:$4 sm:$0xff]  }
  0x6e   : > { %3463 = vmatprep.mubr.msk.bf16.mxu0 %vm738_vm0, %v4141_v58  ;;  %3727 = vmatprep.mubr.msk.bf16.mxu1 %vm738_vm0, %v4143_v59  ;;  %v4236_v57 = vld [vmem:[%s4410_s24 + $0x3b0] ss:$8 sps:$4 sm:$0xff]   ;;  %v4237_v58 = vld [vmem:[%s4410_s24 + $0x184] ss:$8 sps:$4 sm:$0xff]  }
  0x6f   : > { %v4239_v59 = vld [vmem:[%s4410_s24 + $0x3c4] ss:$8 sps:$4 sm:$0xff]  }
  0x75   : > { %951 = vmatmul.mubr.bf16.gmra.mxu0 %v4145_v60  ;;  %2445 = vmatmul.mubr.bf16.gmra.mxu1 %v4146_v61  ;;  %v314_v60 = vld [vmem:[%s4410_s24 + $0x180] sm:$0xff]  ;;  %v315_v61 = vld [vmem:[%s4410_s24 + $0x188] sm:$0xff] }
  0x76   : > { %3464 = vmatprep.mubr.msk.bf16.mxu0 %vm738_vm0, %v4147_v62  ;;  %3728 = vmatprep.mubr.msk.bf16.mxu1 %vm738_vm0, %v4149_v63  ;;  %v3613_v62 = vld [vmem:[%s4410_s24 + $0x3c0] sm:$0xff]  ;;  %v3614_v63 = vld [vmem:[%s4410_s24 + $0x3c8] sm:$0xff] }
  0x7d   : > { %959 = vmatmul.mubr.bf16.gmra.mxu0 %v4151_v0  ;;  %2453 = vmatmul.mubr.bf16.gmra.mxu1 %v4152_v1  ;;  %v3421_v0 = vcombine.low %v314_v60, %v315_v61  ;;  %v3685_v1 = vcombine.low %v3613_v62, %v3614_v63  ;;  %v4251_v60 = vld [vmem:[%s4410_s24 + $0x3f4] ss:$8 sps:$4 sm:$0xff]  }
  0x7e   : > { %3465 = vmatprep.mubr.msk.bf16.mxu0 %vm738_vm0, %v4153_v2  ;;  %3729 = vmatprep.mubr.msk.bf16.mxu1 %vm738_vm0, %v4155_v3  ;;  %v4241_v2 = vld [vmem:[%s4410_s24 + $0x194] ss:$8 sps:$4 sm:$0xff]   ;;  %v4602_v3 = vld [vmem:[%s5309_s2] ss:$0 sm:$0xff] }
  0x85   : > { %967 = vmatmul.mubr.bf16.gmra.mxu0 %v4157_v4  ;;  %2461 = vmatmul.mubr.bf16.gmra.mxu1 %v4158_v5  ;;  %v4243_v4 = vld [vmem:[%s4410_s24 + $0x3d4] ss:$8 sps:$4 sm:$0xff]   ;;  %v4608_v5 = vld [vmem:[%s5310_s3] ss:$0 sm:$0xff] }
  0x86   : > { %3466 = vmatprep.mubr.msk.bf16.mxu0 %vm738_vm0, %v4159_v6  ;;  %3730 = vmatprep.mubr.msk.bf16.mxu1 %vm738_vm0, %v4161_v7 }
  0x8d   : > { %975 = vmatmul.mubr.bf16.gmra.mxu0 %v4163_v8  ;;  %2469 = vmatmul.mubr.bf16.gmra.mxu1 %v4164_v9  ;;  %v316_v9 = vld [vmem:[%s4410_s24 + $0x190] sm:$0xff] }
  0x8e   : > { %3467 = vmatprep.mubr.msk.bf16.mxu0 %vm738_vm0, %v4165_v10  ;;  %3731 = vmatprep.mubr.msk.bf16.mxu1 %vm738_vm0, %v4167_v11  ;;  %v317_v10 = vld [vmem:[%s4410_s24 + $0x198] sm:$0xff] }
  0x95   : > { %983 = vmatmul.mubr.bf16.gmra.mxu0 %v4169_v12  ;;  %2477 = vmatmul.mubr.bf16.gmra.mxu1 %v4170_v13  ;;  %v3615_v13 = vld [vmem:[%s4410_s24 + $0x3d0] sm:$0xff] }
  0x96   : > { %3468 = vmatprep.mubr.msk.bf16.mxu0 %vm738_vm0, %v4171_v14  ;;  %3732 = vmatprep.mubr.msk.bf16.mxu1 %vm738_vm0, %v4173_v15  ;;  %v3616_v14 = vld [vmem:[%s4410_s24 + $0x3d8] sm:$0xff] }
  0x9d   : > { %991 = vmatmul.mubr.bf16.gmra.mxu0 %v4175_v16  ;;  %2485 = vmatmul.mubr.bf16.gmra.mxu1 %v4176_v17 }
  0x9e   : > { %3469 = vmatprep.mubr.msk.bf16.mxu0 %vm738_vm0, %v4177_v18  ;;  %3733 = vmatprep.mubr.msk.bf16.mxu1 %vm738_vm0, %v4179_v19  ;;  %v3423_v19 = vcombine.low %v316_v9, %v317_v10  ;;  %v321_v9 = vld [vmem:[%s4410_s24 + $0x1b8] sm:$0xff] }
  0xa5   : > { %999 = vmatmul.mubr.bf16.gmra.mxu0 %v4181_v20  ;;  %2493 = vmatmul.mubr.bf16.gmra.mxu1 %v4182_v21 }
  0xa6   : > { %3470 = vmatprep.mubr.msk.bf16.mxu0 %vm738_vm0, %v4183_v22  ;;  %3734 = vmatprep.mubr.msk.bf16.mxu1 %vm738_vm0, %v4185_v23  ;;  %v3687_v23 = vcombine.low %v3615_v13, %v3616_v14  ;;  %v3619_v13 = vld [vmem:[%s4410_s24 + $0x3f0] sm:$0xff]  ;;  %v3620_v14 = vld [vmem:[%s4410_s24 + $0x3f8] sm:$0xff] }
  0xad   : > { %1007 = vmatmul.mubr.bf16.gmra.mxu0 %v4187_v24  ;;  %2501 = vmatmul.mubr.bf16.gmra.mxu1 %v4188_v25  ;;  %v4245_v24 = vld [vmem:[%s4410_s24 + $0x1a4] ss:$8 sps:$4 sm:$0xff]  }
  0xae   : > { %3471 = vmatprep.mubr.msk.bf16.mxu0 %vm738_vm0, %v4189_v26  ;;  %3735 = vmatprep.mubr.msk.bf16.mxu1 %vm738_vm0, %v4191_v27 }
  0xb5   : > { %1015 = vmatmul.mubr.bf16.gmra.mxu0 %v4193_v28  ;;  %2509 = vmatmul.mubr.bf16.gmra.mxu1 %v4194_v29  ;;  %v4247_v28 = vld [vmem:[%s4410_s24 + $0x3e4] ss:$8 sps:$4 sm:$0xff]  }
  0xb6   : > { %3472 = vmatprep.mubr.msk.bf16.mxu0 %vm738_vm0, %v4195_v30  ;;  %3736 = vmatprep.mubr.msk.bf16.mxu1 %vm738_vm0, %v4197_v31 }
  0xbd   : > { %1023 = vmatmul.mubr.bf16.gmra.mxu0 %v4199_v32  ;;  %2517 = vmatmul.mubr.bf16.gmra.mxu1 %v4200_v33 }
  0xbe   : > { %3473 = vmatprep.mubr.msk.bf16.mxu0 %vm738_vm0, %v4201_v34  ;;  %3737 = vmatprep.mubr.msk.bf16.mxu1 %vm738_vm0, %v4203_v35 }
  0xc5   : > { %1031 = vmatmul.mubr.bf16.gmra.mxu0 %v4205_v36  ;;  %2525 = vmatmul.mubr.bf16.gmra.mxu1 %v4206_v37 }
  0xc6   : > { %3474 = vmatprep.mubr.msk.bf16.mxu0 %vm738_vm0, %v4207_v38  ;;  %3738 = vmatprep.mubr.msk.bf16.mxu1 %vm738_vm0, %v4209_v39  ;;  %v318_v38 = vld [vmem:[%s4410_s24 + $0x1a0] sm:$0xff]  ;;  %v319_v39 = vld [vmem:[%s4410_s24 + $0x1a8] sm:$0xff] }
  0xcd   : > { %1039 = vmatmul.mubr.bf16.gmra.mxu0 %v4211_v40  ;;  %2533 = vmatmul.mubr.bf16.gmra.mxu1 %v4212_v41 }
  0xce   : > { %3475 = vmatprep.mubr.msk.bf16.mxu0 %vm738_vm0, %v4213_v42  ;;  %3739 = vmatprep.mubr.msk.bf16.mxu1 %vm738_vm0, %v4215_v43  ;;  %v3617_v43 = vld [vmem:[%s4410_s24 + $0x3e0] sm:$0xff] }
  0xd5   : > { %1047 = vmatmul.mubr.bf16.gmra.mxu0 %v4217_v44  ;;  %2541 = vmatmul.mubr.bf16.gmra.mxu1 %v4218_v45  ;;  %v3618_v44 = vld [vmem:[%s4410_s24 + $0x3e8] sm:$0xff] }
  0xd6   : > { %3476 = vmatprep.mubr.msk.bf16.mxu0 %vm738_vm0, %v4219_v46  ;;  %3740 = vmatprep.mubr.msk.bf16.mxu1 %vm738_vm0, %v4221_v47 }
  0xdd   : > { %1055 = vmatmul.mubr.bf16.gmra.mxu0 %v4223_v48  ;;  %2549 = vmatmul.mubr.bf16.gmra.mxu1 %v4224_v49 }
  0xde   : > { %3477 = vmatprep.mubr.msk.bf16.mxu0 %vm738_vm0, %v4225_v50  ;;  %3741 = vmatprep.mubr.msk.bf16.mxu1 %vm738_vm0, %v4227_v51  ;;  %v3425_v51 = vcombine.low %v318_v38, %v319_v39 }
  0xe5   : > { %1063 = vmatmul.mubr.bf16.gmra.mxu0 %v4229_v52  ;;  %2557 = vmatmul.mubr.bf16.gmra.mxu1 %v4230_v53 }
  0xe6   : > { %3478 = vmatprep.mubr.msk.bf16.mxu0 %vm738_vm0, %v4231_v54  ;;  %3742 = vmatprep.mubr.msk.bf16.mxu1 %vm738_vm0, %v4233_v55  ;;  %v3689_v55 = vcombine.low %v3617_v43, %v3618_v44 }
  0xed   : > { %1071 = vmatmul.mubr.bf16.gmra.mxu0 %v4235_v56  ;;  %2565 = vmatmul.mubr.bf16.gmra.mxu1 %v4236_v57  ;;  %v4249_v56 = vld [vmem:[%s4410_s24 + $0x1b4] ss:$8 sps:$4 sm:$0xff]  }
  0xee   : > { %3479 = vmatprep.mubr.msk.bf16.mxu0 %vm738_vm0, %v4237_v58  ;;  %3743 = vmatprep.mubr.msk.bf16.mxu1 %vm738_vm0, %v4239_v59 }
  0xf5   : > { %v888_v6 = vpop.f32.mrf.mxu0  ;;  %1079 = vmatmul.mubr.bf16.gmra.mxu0 %v3421_v0  ;;  %v2382_v8 = vpop.f32.mrf.mxu1  ;;  %2573 = vmatmul.mubr.bf16.gmra.mxu1 %v3685_v1 }
  0xf6   : > { %v1181_v7 = vmul.f32 %v4602_v3, %v888_v6  ;;  %3480 = vmatprep.mubr.msk.bf16.mxu0 %vm738_vm0, %v4241_v2  ;;  %v2669_v11 = vmul.f32 %v4602_v3, %v2382_v8  ;;  %3744 = vmatprep.mubr.msk.bf16.mxu1 %vm738_vm0, %v4243_v4  ;;  %v320_v8 = vld [vmem:[%s4410_s24 + $0x1b0] sm:$0xff] }
  0xf7   : > { %v890_v12 = vpop.f32.mrf.mxu0  ;;  %v2384_v16 = vpop.f32.mrf.mxu1 }
  0xf8   : > { %v1259_v15 = vadd.f32 %v4608_v5, %v1181_v7  ;;  %v2741_v17 = vadd.f32 %v4608_v5, %v2669_v11 }
  0xf9   : > { %v891_v18 = vpop.f32.mrf.mxu0  ;;  %v2385_v22 = vpop.f32.mrf.mxu1 }
  0xfa   : > { %v1331_v20 = vmax.f32 %v1259_v15, 0.0  ;;  %v1182_v21 = vmul.f32 %v4602_v3, %v891_v18  ;;  %v2813_v25 = vmax.f32 %v2741_v17, 0.0  ;;  %v2670_v26 = vmul.f32 %v4602_v3, %v2385_v22 }
  0xfb   : > { %v893_v27 = vpop.f32.mrf.mxu0  ;;  %v2387_v31 = vpop.f32.mrf.mxu1 }
  0xfc   : > { %v3901_v29 = vpack.c.bf16 %v1331_v20, %v1331_v20  ;;  %v1260_v30 = vadd.f32 %v4608_v5, %v1182_v21  ;;  %v3973_v32 = vpack.c.bf16 %v2813_v25, %v2813_v25  ;;  %v2742_v33 = vadd.f32 %v4608_v5, %v2670_v26  ;;  %v4253_v26 = vld [vmem:[%s4410_s24 + $0x1c4] ss:$8 sps:$4 sm:$0xff]  }
  0xfd   : > { %v896_v34 = vpop.f32.mrf.mxu0  ;;  %1087 = vmatmul.mubr.bf16.gmra.mxu0 %v3423_v19  ;;  %v2390_v37 = vpop.f32.mrf.mxu1  ;;  %2581 = vmatmul.mubr.bf16.gmra.mxu1 %v3687_v23  ;;  %v3427_v21 = vcombine.low %v320_v8, %v321_v9  ;;  %v3691_v25 = vcombine.low %v3619_v13, %v3620_v14 }
  0xfe   : > { %1692 = vst.msk [vmem:[%s4626_s26] sm:$0xf] %vm1691_vm3, %v3901_v29  ;;  %v1332_v35 = vmax.f32 %v1260_v30, 0.0  ;;  %v1183_v36 = vmul.f32 %v4602_v3, %v896_v34  ;;  %3481 = vmatprep.mubr.msk.bf16.mxu0 %vm738_vm0, %v4245_v24  ;;  %3827 = vst.msk [vmem:[%s4626_s26 + $0x120] sm:$0xf] %vm1691_vm3, %v3973_v32  ;;  %v2814_v40 = vmax.f32 %v2742_v33, 0.0  ;;  %v2671_v41 = vmul.f32 %v4602_v3, %v2390_v37 }
  0xff   : > { %v898_v42 = vpop.f32.mrf.mxu0  ;;  %3745 = vmatprep.mubr.msk.bf16.mxu1 %vm738_vm0, %v4247_v28  ;;  %v2392_v47 = vpop.f32.mrf.mxu1  ;;  %v4255_v30 = vld [vmem:[%s4410_s24 + $0x404] ss:$8 sps:$4 sm:$0xff]  }
 0x100   : > { %v3902_v45 = vpack.c.bf16 %v1332_v35, %v1332_v35  ;;  %v1261_v46 = vadd.f32 %v4608_v5, %v1183_v36  ;;  %v3974_v48 = vpack.c.bf16 %v2814_v40, %v2814_v40  ;;  %v2743_v49 = vadd.f32 %v4608_v5, %v2671_v41  ;;  %v322_v40 = vld [vmem:[%s4410_s24 + $0x1c0] sm:$0xff]  ;;  %v323_v41 = vld [vmem:[%s4410_s24 + $0x1c8] sm:$0xff] }
 0x101   : > { %v899_v50 = vpop.f32.mrf.mxu0  ;;  %v2393_v54 = vpop.f32.mrf.mxu1 }
 0x102   : > { %1693 = vst.msk [vmem:[%s4626_s26 + $0x4] sm:$0xf] %vm1691_vm3, %v3902_v45  ;;  %v1333_v52 = vmax.f32 %v1261_v46, 0.0  ;;  %v1184_v53 = vmul.f32 %v4602_v3, %v899_v50  ;;  %3828 = vst.msk [vmem:[%s4626_s26 + $0x124] sm:$0xf] %vm1691_vm3, %v3974_v48  ;;  %v2815_v57 = vmax.f32 %v2743_v49, 0.0  ;;  %v2672_v58 = vmul.f32 %v4602_v3, %v2393_v54 }
 0x103   : > { %v901_v59 = vpop.f32.mrf.mxu0  ;;  %v2395_v63 = vpop.f32.mrf.mxu1  ;;  %v3621_v45 = vld [vmem:[%s4410_s24 + $0x400] sm:$0xff]  ;;  %v3622_v46 = vld [vmem:[%s4410_s24 + $0x408] sm:$0xff] }
 0x104   : > { %v3903_v61 = vpack.c.bf16 %v1333_v52, %v1333_v52  ;;  %v1262_v62 = vadd.f32 %v4608_v5, %v1184_v53  ;;  %v3975_v0 = vpack.c.bf16 %v2815_v57, %v2815_v57  ;;  %v2744_v1 = vadd.f32 %v4608_v5, %v2672_v58  ;;  %v4257_v58 = vld [vmem:[%s4410_s24 + $0x1d4] ss:$8 sps:$4 sm:$0xff]  }
 0x105   : > { %v904_v2 = vpop.f32.mrf.mxu0  ;;  %1095 = vmatmul.mubr.bf16.gmra.mxu0 %v3425_v51  ;;  %v2398_v7 = vpop.f32.mrf.mxu1  ;;  %2589 = vmatmul.mubr.bf16.gmra.mxu1 %v3689_v55  ;;  %v3429_v53 = vcombine.low %v322_v40, %v323_v41  ;;  %v3693_v57 = vcombine.low %v3621_v45, %v3622_v46 }
 0x106   : > { %1694 = vst.msk [vmem:[%s4626_s26 + $0x8] sm:$0xf] %vm1691_vm3, %v3903_v61  ;;  %v1334_v4 = vmax.f32 %v1262_v62, 0.0  ;;  %v1185_v6 = vmul.f32 %v4602_v3, %v904_v2  ;;  %3482 = vmatprep.mubr.msk.bf16.mxu0 %vm738_vm0, %v4249_v56  ;;  %3829 = vst.msk [vmem:[%s4626_s26 + $0x128] sm:$0xf] %vm1691_vm3, %v3975_v0  ;;  %v2816_v10 = vmax.f32 %v2744_v1, 0.0  ;;  %v2673_v11 = vmul.f32 %v4602_v3, %v2398_v7 }
 0x107   : > { %v906_v12 = vpop.f32.mrf.mxu0  ;;  %3746 = vmatprep.mubr.msk.bf16.mxu1 %vm738_vm0, %v4251_v60  ;;  %v2400_v17 = vpop.f32.mrf.mxu1  ;;  %v4259_v62 = vld [vmem:[%s4410_s24 + $0x414] ss:$8 sps:$4 sm:$0xff]  }
 0x108   : > { %v3904_v15 = vpack.c.bf16 %v1334_v4, %v1334_v4  ;;  %v1263_v16 = vadd.f32 %v4608_v5, %v1185_v6  ;;  %v3976_v18 = vpack.c.bf16 %v2816_v10, %v2816_v10  ;;  %v2745_v19 = vadd.f32 %v4608_v5, %v2673_v11  ;;  %v324_v10 = vld [vmem:[%s4410_s24 + $0x1d0] sm:$0xff]  ;;  %v325_v11 = vld [vmem:[%s4410_s24 + $0x1d8] sm:$0xff] }
 0x109   : > { %v907_v20 = vpop.f32.mrf.mxu0  ;;  %v2401_v24 = vpop.f32.mrf.mxu1 }
 0x10a   : > { %1695 = vst.msk [vmem:[%s4626_s26 + $0xc] sm:$0xf] %vm1691_vm3, %v3904_v15  ;;  %v1335_v22 = vmax.f32 %v1263_v16, 0.0  ;;  %v1186_v23 = vmul.f32 %v4602_v3, %v907_v20  ;;  %3830 = vst.msk [vmem:[%s4626_s26 + $0x12c] sm:$0xf] %vm1691_vm3, %v3976_v18  ;;  %v2817_v27 = vmax.f32 %v2745_v19, 0.0  ;;  %v2674_v28 = vmul.f32 %v4602_v3, %v2401_v24 }
 0x10b   : > { %v909_v29 = vpop.f32.mrf.mxu0  ;;  %v2403_v33 = vpop.f32.mrf.mxu1  ;;  %v3623_v15 = vld [vmem:[%s4410_s24 + $0x410] sm:$0xff]  ;;  %v3624_v16 = vld [vmem:[%s4410_s24 + $0x418] sm:$0xff] }
 0x10c   : > { %v3905_v31 = vpack.c.bf16 %v1335_v22, %v1335_v22  ;;  %v1264_v32 = vadd.f32 %v4608_v5, %v1186_v23  ;;  %v3977_v34 = vpack.c.bf16 %v2817_v27, %v2817_v27  ;;  %v2746_v35 = vadd.f32 %v4608_v5, %v2674_v28  ;;  %v4261_v28 = vld [vmem:[%s4410_s24 + $0x1e4] ss:$8 sps:$4 sm:$0xff]  }
 0x10d   : > { %v912_v36 = vpop.f32.mrf.mxu0  ;;  %1103 = vmatmul.mubr.bf16.gmra.mxu0 %v3427_v21  ;;  %v2406_v39 = vpop.f32.mrf.mxu1  ;;  %2597 = vmatmul.mubr.bf16.gmra.mxu1 %v3691_v25  ;;  %v3431_v23 = vcombine.low %v324_v10, %v325_v11  ;;  %v3695_v27 = vcombine.low %v3623_v15, %v3624_v16 }
 0x10e   : > { %1696 = vst.msk [vmem:[%s4626_s26 + $0x10] sm:$0xf] %vm1691_vm3, %v3905_v31  ;;  %v1336_v37 = vmax.f32 %v1264_v32, 0.0  ;;  %v1187_v38 = vmul.f32 %v4602_v3, %v912_v36  ;;  %3483 = vmatprep.mubr.msk.bf16.mxu0 %vm738_vm0, %v4253_v26  ;;  %3831 = vst.msk [vmem:[%s4626_s26 + $0x130] sm:$0xf] %vm1691_vm3, %v3977_v34  ;;  %v2818_v42 = vmax.f32 %v2746_v35, 0.0  ;;  %v2675_v43 = vmul.f32 %v4602_v3, %v2406_v39 }
 0x10f   : > { %v914_v44 = vpop.f32.mrf.mxu0  ;;  %3747 = vmatprep.mubr.msk.bf16.mxu1 %vm738_vm0, %v4255_v30  ;;  %v2408_v49 = vpop.f32.mrf.mxu1  ;;  %v4263_v32 = vld [vmem:[%s4410_s24 + $0x424] ss:$8 sps:$4 sm:$0xff]  }
 0x110   : > { %v3906_v47 = vpack.c.bf16 %v1336_v37, %v1336_v37  ;;  %v1265_v48 = vadd.f32 %v4608_v5, %v1187_v38  ;;  %v3978_v50 = vpack.c.bf16 %v2818_v42, %v2818_v42  ;;  %v2747_v51 = vadd.f32 %v4608_v5, %v2675_v43  ;;  %v326_v42 = vld [vmem:[%s4410_s24 + $0x1e0] sm:$0xff]  ;;  %v327_v43 = vld [vmem:[%s4410_s24 + $0x1e8] sm:$0xff] }
 0x111   : > { %v915_v52 = vpop.f32.mrf.mxu0  ;;  %v2409_v56 = vpop.f32.mrf.mxu1 }
 0x112   : > { %1697 = vst.msk [vmem:[%s4626_s26 + $0x14] sm:$0xf] %vm1691_vm3, %v3906_v47  ;;  %v1337_v54 = vmax.f32 %v1265_v48, 0.0  ;;  %v1188_v55 = vmul.f32 %v4602_v3, %v915_v52  ;;  %3832 = vst.msk [vmem:[%s4626_s26 + $0x134] sm:$0xf] %vm1691_vm3, %v3978_v50  ;;  %v2819_v59 = vmax.f32 %v2747_v51, 0.0  ;;  %v2676_v60 = vmul.f32 %v4602_v3, %v2409_v56 }
 0x113   : > { %v917_v61 = vpop.f32.mrf.mxu0  ;;  %v2411_v1 = vpop.f32.mrf.mxu1  ;;  %v3625_v47 = vld [vmem:[%s4410_s24 + $0x420] sm:$0xff]  ;;  %v3626_v48 = vld [vmem:[%s4410_s24 + $0x428] sm:$0xff] }
 0x114   : > { %v3907_v63 = vpack.c.bf16 %v1337_v54, %v1337_v54  ;;  %v1266_v0 = vadd.f32 %v4608_v5, %v1188_v55  ;;  %v3979_v2 = vpack.c.bf16 %v2819_v59, %v2819_v59  ;;  %v2748_v4 = vadd.f32 %v4608_v5, %v2676_v60  ;;  %v4265_v60 = vld [vmem:[%s4410_s24 + $0x1f4] ss:$8 sps:$4 sm:$0xff]  }
 0x115   : > { %v920_v6 = vpop.f32.mrf.mxu0  ;;  %1111 = vmatmul.mubr.bf16.gmra.mxu0 %v3429_v53  ;;  %v2414_v9 = vpop.f32.mrf.mxu1  ;;  %2605 = vmatmul.mubr.bf16.gmra.mxu1 %v3693_v57  ;;  %v3433_v55 = vcombine.low %v326_v42, %v327_v43  ;;  %v3697_v59 = vcombine.low %v3625_v47, %v3626_v48 }
 0x116   : > { %1698 = vst.msk [vmem:[%s4626_s26 + $0x18] sm:$0xf] %vm1691_vm3, %v3907_v63  ;;  %v1338_v7 = vmax.f32 %v1266_v0, 0.0  ;;  %v1189_v8 = vmul.f32 %v4602_v3, %v920_v6  ;;  %3484 = vmatprep.mubr.msk.bf16.mxu0 %vm738_vm0, %v4257_v58  ;;  %3833 = vst.msk [vmem:[%s4626_s26 + $0x138] sm:$0xf] %vm1691_vm3, %v3979_v2  ;;  %v2820_v12 = vmax.f32 %v2748_v4, 0.0  ;;  %v2677_v13 = vmul.f32 %v4602_v3, %v2414_v9 }
 0x117   : > { %v922_v14 = vpop.f32.mrf.mxu0  ;;  %3748 = vmatprep.mubr.msk.bf16.mxu1 %vm738_vm0, %v4259_v62  ;;  %v2416_v19 = vpop.f32.mrf.mxu1  ;;  %v4267_v0 = vld [vmem:[%s4410_s24 + $0x434] ss:$8 sps:$4 sm:$0xff]  }
 0x118   : > { %v3908_v17 = vpack.c.bf16 %v1338_v7, %v1338_v7  ;;  %v1267_v18 = vadd.f32 %v4608_v5, %v1189_v8  ;;  %v3980_v20 = vpack.c.bf16 %v2820_v12, %v2820_v12  ;;  %v2749_v21 = vadd.f32 %v4608_v5, %v2677_v13  ;;  %v328_v12 = vld [vmem:[%s4410_s24 + $0x1f0] sm:$0xff]  ;;  %v329_v13 = vld [vmem:[%s4410_s24 + $0x1f8] sm:$0xff] }
 0x119   : > { %v923_v22 = vpop.f32.mrf.mxu0  ;;  %v2417_v26 = vpop.f32.mrf.mxu1 }
 0x11a   : > { %1699 = vst.msk [vmem:[%s4626_s26 + $0x1c] sm:$0xf] %vm1691_vm3, %v3908_v17  ;;  %v1339_v24 = vmax.f32 %v1267_v18, 0.0  ;;  %v1190_v25 = vmul.f32 %v4602_v3, %v923_v22  ;;  %3834 = vst.msk [vmem:[%s4626_s26 + $0x13c] sm:$0xf] %vm1691_vm3, %v3980_v20  ;;  %v2821_v29 = vmax.f32 %v2749_v21, 0.0  ;;  %v2678_v30 = vmul.f32 %v4602_v3, %v2417_v26 }
 0x11b   : > { %v925_v31 = vpop.f32.mrf.mxu0  ;;  %v2419_v35 = vpop.f32.mrf.mxu1  ;;  %v3627_v17 = vld [vmem:[%s4410_s24 + $0x430] sm:$0xff]  ;;  %v3628_v18 = vld [vmem:[%s4410_s24 + $0x438] sm:$0xff] }
 0x11c   : > { %v3909_v33 = vpack.c.bf16 %v1339_v24, %v1339_v24  ;;  %v1268_v34 = vadd.f32 %v4608_v5, %v1190_v25  ;;  %v3981_v36 = vpack.c.bf16 %v2821_v29, %v2821_v29  ;;  %v2750_v37 = vadd.f32 %v4608_v5, %v2678_v30  ;;  %v4269_v30 = vld [vmem:[%s4410_s24 + $0x204] ss:$8 sps:$4 sm:$0xff]  }
 0x11d   : > { %v928_v38 = vpop.f32.mrf.mxu0  ;;  %1119 = vmatmul.mubr.bf16.gmra.mxu0 %v3431_v23  ;;  %v2422_v41 = vpop.f32.mrf.mxu1  ;;  %2613 = vmatmul.mubr.bf16.gmra.mxu1 %v3695_v27  ;;  %v3435_v25 = vcombine.low %v328_v12, %v329_v13  ;;  %v3699_v29 = vcombine.low %v3627_v17, %v3628_v18 }
 0x11e   : > { %1700 = vst.msk [vmem:[%s4626_s26 + $0x20] sm:$0xf] %vm1691_vm3, %v3909_v33  ;;  %v1340_v39 = vmax.f32 %v1268_v34, 0.0  ;;  %v1191_v40 = vmul.f32 %v4602_v3, %v928_v38  ;;  %3485 = vmatprep.mubr.msk.bf16.mxu0 %vm738_vm0, %v4261_v28  ;;  %3835 = vst.msk [vmem:[%s4626_s26 + $0x140] sm:$0xf] %vm1691_vm3, %v3981_v36  ;;  %v2822_v44 = vmax.f32 %v2750_v37, 0.0  ;;  %v2679_v45 = vmul.f32 %v4602_v3, %v2422_v41 }
 0x11f   : > { %v930_v46 = vpop.f32.mrf.mxu0  ;;  %3749 = vmatprep.mubr.msk.bf16.mxu1 %vm738_vm0, %v4263_v32  ;;  %v2424_v51 = vpop.f32.mrf.mxu1  ;;  %v4271_v34 = vld [vmem:[%s4410_s24 + $0x444] ss:$8 sps:$4 sm:$0xff]  }
 0x120   : > { %v3910_v49 = vpack.c.bf16 %v1340_v39, %v1340_v39  ;;  %v1269_v50 = vadd.f32 %v4608_v5, %v1191_v40  ;;  %v3982_v52 = vpack.c.bf16 %v2822_v44, %v2822_v44  ;;  %v2751_v53 = vadd.f32 %v4608_v5, %v2679_v45  ;;  %v330_v44 = vld [vmem:[%s4410_s24 + $0x200] sm:$0xff]  ;;  %v331_v45 = vld [vmem:[%s4410_s24 + $0x208] sm:$0xff] }
 0x121   : > { %v931_v54 = vpop.f32.mrf.mxu0  ;;  %v2425_v58 = vpop.f32.mrf.mxu1 }
 0x122   : > { %1701 = vst.msk [vmem:[%s4626_s26 + $0x24] sm:$0xf] %vm1691_vm3, %v3910_v49  ;;  %v1341_v56 = vmax.f32 %v1269_v50, 0.0  ;;  %v1192_v57 = vmul.f32 %v4602_v3, %v931_v54  ;;  %3836 = vst.msk [vmem:[%s4626_s26 + $0x144] sm:$0xf] %vm1691_vm3, %v3982_v52  ;;  %v2823_v61 = vmax.f32 %v2751_v53, 0.0  ;;  %v2680_v62 = vmul.f32 %v4602_v3, %v2425_v58 }
 0x123   : > { %v933_v63 = vpop.f32.mrf.mxu0  ;;  %v2427_v4 = vpop.f32.mrf.mxu1  ;;  %v3629_v49 = vld [vmem:[%s4410_s24 + $0x440] sm:$0xff]  ;;  %v3630_v50 = vld [vmem:[%s4410_s24 + $0x448] sm:$0xff] }
 0x124   : > { %v3911_v1 = vpack.c.bf16 %v1341_v56, %v1341_v56  ;;  %v1270_v2 = vadd.f32 %v4608_v5, %v1192_v57  ;;  %v3983_v6 = vpack.c.bf16 %v2823_v61, %v2823_v61  ;;  %v2752_v7 = vadd.f32 %v4608_v5, %v2680_v62  ;;  %v4273_v62 = vld [vmem:[%s4410_s24 + $0x214] ss:$8 sps:$4 sm:$0xff]  }
 0x125   : > { %v936_v8 = vpop.f32.mrf.mxu0  ;;  %1127 = vmatmul.mubr.bf16.gmra.mxu0 %v3433_v55  ;;  %v2430_v11 = vpop.f32.mrf.mxu1  ;;  %2621 = vmatmul.mubr.bf16.gmra.mxu1 %v3697_v59  ;;  %v3437_v57 = vcombine.low %v330_v44, %v331_v45  ;;  %v3701_v61 = vcombine.low %v3629_v49, %v3630_v50 }
 0x126   : > { %1702 = vst.msk [vmem:[%s4626_s26 + $0x28] sm:$0xf] %vm1691_vm3, %v3911_v1  ;;  %v1342_v9 = vmax.f32 %v1270_v2, 0.0  ;;  %v1193_v10 = vmul.f32 %v4602_v3, %v936_v8  ;;  %3486 = vmatprep.mubr.msk.bf16.mxu0 %vm738_vm0, %v4265_v60  ;;  %3837 = vst.msk [vmem:[%s4626_s26 + $0x148] sm:$0xf] %vm1691_vm3, %v3983_v6  ;;  %v2824_v14 = vmax.f32 %v2752_v7, 0.0  ;;  %v2681_v15 = vmul.f32 %v4602_v3, %v2430_v11 }
 0x127   : > { %v938_v16 = vpop.f32.mrf.mxu0  ;;  %3750 = vmatprep.mubr.msk.bf16.mxu1 %vm738_vm0, %v4267_v0  ;;  %v2432_v21 = vpop.f32.mrf.mxu1  ;;  %v4275_v2 = vld [vmem:[%s4410_s24 + $0x454] ss:$8 sps:$4 sm:$0xff]  }
 0x128   : > { %v3912_v19 = vpack.c.bf16 %v1342_v9, %v1342_v9  ;;  %v1271_v20 = vadd.f32 %v4608_v5, %v1193_v10  ;;  %v3984_v22 = vpack.c.bf16 %v2824_v14, %v2824_v14  ;;  %v2753_v23 = vadd.f32 %v4608_v5, %v2681_v15  ;;  %v332_v14 = vld [vmem:[%s4410_s24 + $0x210] sm:$0xff]  ;;  %v333_v15 = vld [vmem:[%s4410_s24 + $0x218] sm:$0xff] }
 0x129   : > { %v939_v24 = vpop.f32.mrf.mxu0  ;;  %v2433_v28 = vpop.f32.mrf.mxu1 }
 0x12a   : > { %1703 = vst.msk [vmem:[%s4626_s26 + $0x2c] sm:$0xf] %vm1691_vm3, %v3912_v19  ;;  %v1343_v26 = vmax.f32 %v1271_v20, 0.0  ;;  %v1194_v27 = vmul.f32 %v4602_v3, %v939_v24  ;;  %3838 = vst.msk [vmem:[%s4626_s26 + $0x14c] sm:$0xf] %vm1691_vm3, %v3984_v22  ;;  %v2825_v31 = vmax.f32 %v2753_v23, 0.0  ;;  %v2682_v32 = vmul.f32 %v4602_v3, %v2433_v28 }
 0x12b   : > { %v941_v33 = vpop.f32.mrf.mxu0  ;;  %v2435_v37 = vpop.f32.mrf.mxu1  ;;  %v3631_v19 = vld [vmem:[%s4410_s24 + $0x450] sm:$0xff]  ;;  %v3632_v20 = vld [vmem:[%s4410_s24 + $0x458] sm:$0xff] }
 0x12c   : > { %v3913_v35 = vpack.c.bf16 %v1343_v26, %v1343_v26  ;;  %v1272_v36 = vadd.f32 %v4608_v5, %v1194_v27  ;;  %v3985_v38 = vpack.c.bf16 %v2825_v31, %v2825_v31  ;;  %v2754_v39 = vadd.f32 %v4608_v5, %v2682_v32  ;;  %v4277_v32 = vld [vmem:[%s4410_s24 + $0x224] ss:$8 sps:$4 sm:$0xff]  }
 0x12d   : > { %v944_v40 = vpop.f32.mrf.mxu0  ;;  %1135 = vmatmul.mubr.bf16.gmra.mxu0 %v3435_v25  ;;  %v2438_v43 = vpop.f32.mrf.mxu1  ;;  %2629 = vmatmul.mubr.bf16.gmra.mxu1 %v3699_v29  ;;  %v3439_v27 = vcombine.low %v332_v14, %v333_v15  ;;  %v3703_v31 = vcombine.low %v3631_v19, %v3632_v20 }
 0x12e   : > { %1704 = vst.msk [vmem:[%s4626_s26 + $0x30] sm:$0xf] %vm1691_vm3, %v3913_v35  ;;  %v1344_v41 = vmax.f32 %v1272_v36, 0.0  ;;  %v1195_v42 = vmul.f32 %v4602_v3, %v944_v40  ;;  %3487 = vmatprep.mubr.msk.bf16.mxu0 %vm738_vm0, %v4269_v30  ;;  %3839 = vst.msk [vmem:[%s4626_s26 + $0x150] sm:$0xf] %vm1691_vm3, %v3985_v38  ;;  %v2826_v46 = vmax.f32 %v2754_v39, 0.0  ;;  %v2683_v47 = vmul.f32 %v4602_v3, %v2438_v43 }
 0x12f   : > { %v946_v48 = vpop.f32.mrf.mxu0  ;;  %3751 = vmatprep.mubr.msk.bf16.mxu1 %vm738_vm0, %v4271_v34  ;;  %v2440_v53 = vpop.f32.mrf.mxu1  ;;  %v4279_v36 = vld [vmem:[%s4410_s24 + $0x464] ss:$8 sps:$4 sm:$0xff]  }
 0x130   : > { %v3914_v51 = vpack.c.bf16 %v1344_v41, %v1344_v41  ;;  %v1273_v52 = vadd.f32 %v4608_v5, %v1195_v42  ;;  %v3986_v54 = vpack.c.bf16 %v2826_v46, %v2826_v46  ;;  %v2755_v55 = vadd.f32 %v4608_v5, %v2683_v47  ;;  %v334_v46 = vld [vmem:[%s4410_s24 + $0x220] sm:$0xff]  ;;  %v335_v47 = vld [vmem:[%s4410_s24 + $0x228] sm:$0xff] }
 0x131   : > { %v947_v56 = vpop.f32.mrf.mxu0  ;;  %v2441_v60 = vpop.f32.mrf.mxu1 }
 0x132   : > { %1705 = vst.msk [vmem:[%s4626_s26 + $0x34] sm:$0xf] %vm1691_vm3, %v3914_v51  ;;  %v1345_v58 = vmax.f32 %v1273_v52, 0.0  ;;  %v1196_v59 = vmul.f32 %v4602_v3, %v947_v56  ;;  %3840 = vst.msk [vmem:[%s4626_s26 + $0x154] sm:$0xf] %vm1691_vm3, %v3986_v54  ;;  %v2827_v63 = vmax.f32 %v2755_v55, 0.0  ;;  %v2684_v0 = vmul.f32 %v4602_v3, %v2441_v60 }
 0x133   : > { %v949_v1 = vpop.f32.mrf.mxu0  ;;  %v2443_v7 = vpop.f32.mrf.mxu1  ;;  %v3633_v51 = vld [vmem:[%s4410_s24 + $0x460] sm:$0xff]  ;;  %v3634_v52 = vld [vmem:[%s4410_s24 + $0x468] sm:$0xff] }
 0x134   : > { %v3915_v4 = vpack.c.bf16 %v1345_v58, %v1345_v58  ;;  %v1274_v6 = vadd.f32 %v4608_v5, %v1196_v59  ;;  %v3987_v8 = vpack.c.bf16 %v2827_v63, %v2827_v63  ;;  %v2756_v9 = vadd.f32 %v4608_v5, %v2684_v0  ;;  %v4281_v0 = vld [vmem:[%s4410_s24 + $0x234] ss:$8 sps:$4 sm:$0xff]  }
 0x135   : > { %v952_v10 = vpop.f32.mrf.mxu0  ;;  %1143 = vmatmul.mubr.bf16.gmra.mxu0 %v3437_v57  ;;  %v2446_v13 = vpop.f32.mrf.mxu1  ;;  %2637 = vmatmul.mubr.bf16.gmra.mxu1 %v3701_v61  ;;  %v3441_v59 = vcombine.low %v334_v46, %v335_v47  ;;  %v3705_v63 = vcombine.low %v3633_v51, %v3634_v52 }
 0x136   : > { %1706 = vst.msk [vmem:[%s4626_s26 + $0x38] sm:$0xf] %vm1691_vm3, %v3915_v4  ;;  %v1346_v11 = vmax.f32 %v1274_v6, 0.0  ;;  %v1197_v12 = vmul.f32 %v4602_v3, %v952_v10  ;;  %3488 = vmatprep.mubr.msk.bf16.mxu0 %vm738_vm0, %v4273_v62  ;;  %3841 = vst.msk [vmem:[%s4626_s26 + $0x158] sm:$0xf] %vm1691_vm3, %v3987_v8  ;;  %v2828_v16 = vmax.f32 %v2756_v9, 0.0  ;;  %v2685_v17 = vmul.f32 %v4602_v3, %v2446_v13 }
 0x137   : > { %v954_v18 = vpop.f32.mrf.mxu0  ;;  %3752 = vmatprep.mubr.msk.bf16.mxu1 %vm738_vm0, %v4275_v2  ;;  %v2448_v23 = vpop.f32.mrf.mxu1  ;;  %v4283_v6 = vld [vmem:[%s4410_s24 + $0x474] ss:$8 sps:$4 sm:$0xff]  }
 0x138   : > { %v3916_v21 = vpack.c.bf16 %v1346_v11, %v1346_v11  ;;  %v1275_v22 = vadd.f32 %v4608_v5, %v1197_v12  ;;  %v3988_v24 = vpack.c.bf16 %v2828_v16, %v2828_v16  ;;  %v2757_v25 = vadd.f32 %v4608_v5, %v2685_v17  ;;  %v336_v16 = vld [vmem:[%s4410_s24 + $0x230] sm:$0xff]  ;;  %v337_v17 = vld [vmem:[%s4410_s24 + $0x238] sm:$0xff] }
 0x139   : > { %v955_v26 = vpop.f32.mrf.mxu0  ;;  %v2449_v30 = vpop.f32.mrf.mxu1 }
 0x13a   : > { %1707 = vst.msk [vmem:[%s4626_s26 + $0x3c] sm:$0xf] %vm1691_vm3, %v3916_v21  ;;  %v1347_v28 = vmax.f32 %v1275_v22, 0.0  ;;  %v1198_v29 = vmul.f32 %v4602_v3, %v955_v26  ;;  %3842 = vst.msk [vmem:[%s4626_s26 + $0x15c] sm:$0xf] %vm1691_vm3, %v3988_v24  ;;  %v2829_v33 = vmax.f32 %v2757_v25, 0.0  ;;  %v2686_v34 = vmul.f32 %v4602_v3, %v2449_v30 }
 0x13b   : > { %v957_v35 = vpop.f32.mrf.mxu0  ;;  %v2451_v39 = vpop.f32.mrf.mxu1  ;;  %v3635_v21 = vld [vmem:[%s4410_s24 + $0x470] sm:$0xff]  ;;  %v3636_v22 = vld [vmem:[%s4410_s24 + $0x478] sm:$0xff] }
 0x13c   : > { %v3917_v37 = vpack.c.bf16 %v1347_v28, %v1347_v28  ;;  %v1276_v38 = vadd.f32 %v4608_v5, %v1198_v29  ;;  %v3989_v40 = vpack.c.bf16 %v2829_v33, %v2829_v33  ;;  %v2758_v41 = vadd.f32 %v4608_v5, %v2686_v34 }
 0x13d   : > { %v960_v42 = vpop.f32.mrf.mxu0  ;;  %1151 = vmatmul.mubr.bf16.gmra.mxu0 %v3439_v27  ;;  %v2454_v45 = vpop.f32.mrf.mxu1  ;;  %2645 = vmatmul.mubr.bf16.gmra.mxu1 %v3703_v31  ;;  %v3443_v29 = vcombine.low %v336_v16, %v337_v17  ;;  %v3707_v33 = vcombine.low %v3635_v21, %v3636_v22 }
 0x13e   : > { %1708 = vst.msk [vmem:[%s4626_s26 + $0x40] sm:$0xf] %vm1691_vm3, %v3917_v37  ;;  %v1348_v43 = vmax.f32 %v1276_v38, 0.0  ;;  %v1199_v44 = vmul.f32 %v4602_v3, %v960_v42  ;;  %3489 = vmatprep.mubr.msk.bf16.mxu0 %vm738_vm0, %v4277_v32  ;;  %3843 = vst.msk [vmem:[%s4626_s26 + $0x160] sm:$0xf] %vm1691_vm3, %v3989_v40  ;;  %v2830_v48 = vmax.f32 %v2758_v41, 0.0  ;;  %v2687_v49 = vmul.f32 %v4602_v3, %v2454_v45 }
 0x13f   : > { %v962_v50 = vpop.f32.mrf.mxu0  ;;  %3753 = vmatprep.mubr.msk.bf16.mxu1 %vm738_vm0, %v4279_v36  ;;  %v2456_v55 = vpop.f32.mrf.mxu1 }
 0x140   : > { %v3918_v53 = vpack.c.bf16 %v1348_v43, %v1348_v43  ;;  %v1277_v54 = vadd.f32 %v4608_v5, %v1199_v44  ;;  %v3990_v56 = vpack.c.bf16 %v2830_v48, %v2830_v48  ;;  %v2759_v57 = vadd.f32 %v4608_v5, %v2687_v49 }
 0x141   : > { %v963_v58 = vpop.f32.mrf.mxu0  ;;  %v2457_v62 = vpop.f32.mrf.mxu1 }
 0x142   : > { %1709 = vst.msk [vmem:[%s4626_s26 + $0x44] sm:$0xf] %vm1691_vm3, %v3918_v53  ;;  %v1349_v60 = vmax.f32 %v1277_v54, 0.0  ;;  %v1200_v61 = vmul.f32 %v4602_v3, %v963_v58  ;;  %3844 = vst.msk [vmem:[%s4626_s26 + $0x164] sm:$0xf] %vm1691_vm3, %v3990_v56  ;;  %v2831_v1 = vmax.f32 %v2759_v57, 0.0  ;;  %v2688_v2 = vmul.f32 %v4602_v3, %v2457_v62 }
 0x143   : > { %v965_v4 = vpop.f32.mrf.mxu0  ;;  %v2459_v9 = vpop.f32.mrf.mxu1 }
 0x144   : > { %v3919_v7 = vpack.c.bf16 %v1349_v60, %v1349_v60  ;;  %v1278_v8 = vadd.f32 %v4608_v5, %v1200_v61  ;;  %v3991_v10 = vpack.c.bf16 %v2831_v1, %v2831_v1  ;;  %v2760_v11 = vadd.f32 %v4608_v5, %v2688_v2 }
 0x145   : > { %v968_v12 = vpop.f32.mrf.mxu0  ;;  %1159 = vmatmul.mubr.bf16.gmra.mxu0 %v3441_v59  ;;  %v2462_v15 = vpop.f32.mrf.mxu1  ;;  %2653 = vmatmul.mubr.bf16.gmra.mxu1 %v3705_v63 }
 0x146   : > { %1710 = vst.msk [vmem:[%s4626_s26 + $0x48] sm:$0xf] %vm1691_vm3, %v3919_v7  ;;  %v1350_v13 = vmax.f32 %v1278_v8, 0.0  ;;  %v1201_v14 = vmul.f32 %v4602_v3, %v968_v12  ;;  %3490 = vmatprep.mubr.msk.bf16.mxu0 %vm738_vm0, %v4281_v0  ;;  %3845 = vst.msk [vmem:[%s4626_s26 + $0x168] sm:$0xf] %vm1691_vm3, %v3991_v10  ;;  %v2832_v18 = vmax.f32 %v2760_v11, 0.0  ;;  %v2689_v19 = vmul.f32 %v4602_v3, %v2462_v15 }
 0x147   : > { %v970_v20 = vpop.f32.mrf.mxu0  ;;  %3754 = vmatprep.mubr.msk.bf16.mxu1 %vm738_vm0, %v4283_v6  ;;  %v2464_v25 = vpop.f32.mrf.mxu1 }
 0x148   : > { %v3920_v23 = vpack.c.bf16 %v1350_v13, %v1350_v13  ;;  %v1279_v24 = vadd.f32 %v4608_v5, %v1201_v14  ;;  %v3992_v26 = vpack.c.bf16 %v2832_v18, %v2832_v18  ;;  %v2761_v27 = vadd.f32 %v4608_v5, %v2689_v19 }
 0x149   : > { %v971_v28 = vpop.f32.mrf.mxu0  ;;  %v2465_v32 = vpop.f32.mrf.mxu1 }
 0x14a   : > { %1711 = vst.msk [vmem:[%s4626_s26 + $0x4c] sm:$0xf] %vm1691_vm3, %v3920_v23  ;;  %v1351_v30 = vmax.f32 %v1279_v24, 0.0  ;;  %v1202_v31 = vmul.f32 %v4602_v3, %v971_v28  ;;  %3846 = vst.msk [vmem:[%s4626_s26 + $0x16c] sm:$0xf] %vm1691_vm3, %v3992_v26  ;;  %v2833_v34 = vmax.f32 %v2761_v27, 0.0  ;;  %v2690_v35 = vmul.f32 %v4602_v3, %v2465_v32 }
 0x14b   : > { %v973_v36 = vpop.f32.mrf.mxu0  ;;  %v2467_v39 = vpop.f32.mrf.mxu1 }
 0x14c   : > { %v3921_v37 = vpack.c.bf16 %v1351_v30, %v1351_v30  ;;  %v1280_v38 = vadd.f32 %v4608_v5, %v1202_v31  ;;  %v3993_v40 = vpack.c.bf16 %v2833_v34, %v2833_v34  ;;  %v2762_v41 = vadd.f32 %v4608_v5, %v2690_v35 }
 0x14d   : > { %v976_v42 = vpop.f32.mrf.mxu0  ;;  %1167 = vmatmul.mubr.bf16.gmra.mxu0 %v3443_v29  ;;  %v2470_v45 = vpop.f32.mrf.mxu1  ;;  %2661 = vmatmul.mubr.bf16.gmra.mxu1 %v3707_v33 }
 0x14e   : > { %1712 = vst.msk [vmem:[%s4626_s26 + $0x50] sm:$0xf] %vm1691_vm3, %v3921_v37  ;;  %v1352_v43 = vmax.f32 %v1280_v38, 0.0  ;;  %v1203_v44 = vmul.f32 %v4602_v3, %v976_v42  ;;  %3847 = vst.msk [vmem:[%s4626_s26 + $0x170] sm:$0xf] %vm1691_vm3, %v3993_v40  ;;  %v2834_v46 = vmax.f32 %v2762_v41, 0.0  ;;  %v2691_v47 = vmul.f32 %v4602_v3, %v2470_v45 }
 0x14f   : > { %v978_v48 = vpop.f32.mrf.mxu0  ;;  %v2472_v51 = vpop.f32.mrf.mxu1  ;;  %v4918_v45 = vld [vmem:[%s5309_s2] ss:$0 sm:$0xff] }
 0x150   : > { %v3922_v49 = vpack.c.bf16 %v1352_v43, %v1352_v43  ;;  %v1281_v50 = vadd.f32 %v4608_v5, %v1203_v44  ;;  %v3994_v52 = vpack.c.bf16 %v2834_v46, %v2834_v46  ;;  %v2763_v53 = vadd.f32 %v4608_v5, %v2691_v47  ;;  %v4924_v48 = vld [vmem:[%s5310_s3] ss:$0 sm:$0xff] }
 0x151   : > { %v979_v54 = vpop.f32.mrf.mxu0  ;;  %v2473_v57 = vpop.f32.mrf.mxu1 }
 0x152   : > { %1713 = vst.msk [vmem:[%s4626_s26 + $0x54] sm:$0xf] %vm1691_vm3, %v3922_v49  ;;  %v1353_v55 = vmax.f32 %v1281_v50, 0.0  ;;  %v1204_v56 = vmul.f32 %v4602_v3, %v979_v54  ;;  %3848 = vst.msk [vmem:[%s4626_s26 + $0x174] sm:$0xf] %vm1691_vm3, %v3994_v52  ;;  %v2835_v58 = vmax.f32 %v2763_v53, 0.0  ;;  %v2692_v59 = vmul.f32 %v4602_v3, %v2473_v57 }
 0x153   : > { %v981_v60 = vpop.f32.mrf.mxu0  ;;  %v2475_v63 = vpop.f32.mrf.mxu1 }
 0x154   : > { %v3923_v61 = vpack.c.bf16 %v1353_v55, %v1353_v55  ;;  %v1282_v62 = vadd.f32 %v4608_v5, %v1204_v56  ;;  %v3995_v0 = vpack.c.bf16 %v2835_v58, %v2835_v58  ;;  %v2764_v1 = vadd.f32 %v4608_v5, %v2692_v59 }
 0x155   : > { %v984_v2 = vpop.f32.mrf.mxu0  ;;  %v2478_v7 = vpop.f32.mrf.mxu1 }
 0x156   : > { %1714 = vst.msk [vmem:[%s4626_s26 + $0x58] sm:$0xf] %vm1691_vm3, %v3923_v61  ;;  %v1354_v4 = vmax.f32 %v1282_v62, 0.0  ;;  %v1205_v6 = vmul.f32 %v4602_v3, %v984_v2  ;;  %3849 = vst.msk [vmem:[%s4626_s26 + $0x178] sm:$0xf] %vm1691_vm3, %v3995_v0  ;;  %v2836_v8 = vmax.f32 %v2764_v1, 0.0  ;;  %v2693_v9 = vmul.f32 %v4602_v3, %v2478_v7 }
 0x157   : > { %v986_v10 = vpop.f32.mrf.mxu0  ;;  %v2480_v13 = vpop.f32.mrf.mxu1 }
 0x158   : > { %v3924_v11 = vpack.c.bf16 %v1354_v4, %v1354_v4  ;;  %v1283_v12 = vadd.f32 %v4608_v5, %v1205_v6  ;;  %v3996_v14 = vpack.c.bf16 %v2836_v8, %v2836_v8  ;;  %v2765_v15 = vadd.f32 %v4608_v5, %v2693_v9 }
 0x159   : > { %v987_v16 = vpop.f32.mrf.mxu0  ;;  %v2481_v19 = vpop.f32.mrf.mxu1 }
 0x15a   : > { %1715 = vst.msk [vmem:[%s4626_s26 + $0x5c] sm:$0xf] %vm1691_vm3, %v3924_v11  ;;  %v1355_v17 = vmax.f32 %v1283_v12, 0.0  ;;  %v1206_v18 = vmul.f32 %v4602_v3, %v987_v16  ;;  %3850 = vst.msk [vmem:[%s4626_s26 + $0x17c] sm:$0xf] %vm1691_vm3, %v3996_v14  ;;  %v2837_v20 = vmax.f32 %v2765_v15, 0.0  ;;  %v2694_v21 = vmul.f32 %v4602_v3, %v2481_v19 }
 0x15b   : > { %v989_v22 = vpop.f32.mrf.mxu0  ;;  %v2483_v25 = vpop.f32.mrf.mxu1 }
 0x15c   : > { %v3925_v23 = vpack.c.bf16 %v1355_v17, %v1355_v17  ;;  %v1284_v24 = vadd.f32 %v4608_v5, %v1206_v18  ;;  %v3997_v26 = vpack.c.bf16 %v2837_v20, %v2837_v20  ;;  %v2766_v27 = vadd.f32 %v4608_v5, %v2694_v21 }
 0x15d   : > { %v992_v28 = vpop.f32.mrf.mxu0  ;;  %v2486_v31 = vpop.f32.mrf.mxu1 }
 0x15e   : > { %1716 = vst.msk [vmem:[%s4626_s26 + $0x60] sm:$0xf] %vm1691_vm3, %v3925_v23  ;;  %v1356_v29 = vmax.f32 %v1284_v24, 0.0  ;;  %v1207_v30 = vmul.f32 %v4602_v3, %v992_v28  ;;  %3851 = vst.msk [vmem:[%s4626_s26 + $0x180] sm:$0xf] %vm1691_vm3, %v3997_v26  ;;  %v2838_v32 = vmax.f32 %v2766_v27, 0.0  ;;  %v2695_v33 = vmul.f32 %v4602_v3, %v2486_v31 }
 0x15f   : > { %v994_v34 = vpop.f32.mrf.mxu0  ;;  %v2488_v37 = vpop.f32.mrf.mxu1 }
 0x160   : > { %v3926_v35 = vpack.c.bf16 %v1356_v29, %v1356_v29  ;;  %v1285_v36 = vadd.f32 %v4608_v5, %v1207_v30  ;;  %v3998_v38 = vpack.c.bf16 %v2838_v32, %v2838_v32  ;;  %v2767_v39 = vadd.f32 %v4608_v5, %v2695_v33 }
 0x161   : > { %v995_v40 = vpop.f32.mrf.mxu0  ;;  %v2489_v43 = vpop.f32.mrf.mxu1 }
 0x162   : > { %1717 = vst.msk [vmem:[%s4626_s26 + $0x64] sm:$0xf] %vm1691_vm3, %v3926_v35  ;;  %v1357_v41 = vmax.f32 %v1285_v36, 0.0  ;;  %v1208_v42 = vmul.f32 %v4602_v3, %v995_v40  ;;  %3852 = vst.msk [vmem:[%s4626_s26 + $0x184] sm:$0xf] %vm1691_vm3, %v3998_v38  ;;  %v2839_v44 = vmax.f32 %v2767_v39, 0.0  ;;  %v2696_v46 = vmul.f32 %v4918_v45, %v2489_v43 }
 0x163   : > { %v997_v5 = vpop.f32.mrf.mxu0  ;;  %v2491_v49 = vpop.f32.mrf.mxu1 }
 0x164   : > { %v3927_v47 = vpack.c.bf16 %v1357_v41, %v1357_v41  ;;  %v1286_v3 = vadd.f32 %v4924_v48, %v1208_v42  ;;  %v3999_v50 = vpack.c.bf16 %v2839_v44, %v2839_v44  ;;  %v2768_v51 = vadd.f32 %v4924_v48, %v2696_v46 }
 0x165   : > { %v1000_v52 = vpop.f32.mrf.mxu0  ;;  %v2494_v55 = vpop.f32.mrf.mxu1 }
 0x166   : > { %1718 = vst.msk [vmem:[%s4626_s26 + $0x68] sm:$0xf] %vm1691_vm3, %v3927_v47  ;;  %v1358_v53 = vmax.f32 %v1286_v3, 0.0  ;;  %v1209_v54 = vmul.f32 %v4918_v45, %v1000_v52  ;;  %3853 = vst.msk [vmem:[%s4626_s26 + $0x188] sm:$0xf] %vm1691_vm3, %v3999_v50  ;;  %v2840_v56 = vmax.f32 %v2768_v51, 0.0  ;;  %v2697_v57 = vmul.f32 %v4918_v45, %v2494_v55 }
 0x167   : > { %v1002_v58 = vpop.f32.mrf.mxu0  ;;  %v2496_v61 = vpop.f32.mrf.mxu1 }
 0x168   : > { %v3928_v59 = vpack.c.bf16 %v1358_v53, %v1358_v53  ;;  %v1287_v60 = vadd.f32 %v4924_v48, %v1209_v54  ;;  %v4000_v62 = vpack.c.bf16 %v2840_v56, %v2840_v56  ;;  %v2769_v63 = vadd.f32 %v4924_v48, %v2697_v57 }
 0x169   : > { %v1003_v0 = vpop.f32.mrf.mxu0  ;;  %v2497_v4 = vpop.f32.mrf.mxu1 }
 0x16a   : > { %1719 = vst.msk [vmem:[%s4626_s26 + $0x6c] sm:$0xf] %vm1691_vm3, %v3928_v59  ;;  %v1359_v1 = vmax.f32 %v1287_v60, 0.0  ;;  %v1210_v2 = vmul.f32 %v4918_v45, %v1003_v0  ;;  %3854 = vst.msk [vmem:[%s4626_s26 + $0x18c] sm:$0xf] %vm1691_vm3, %v4000_v62  ;;  %v2841_v6 = vmax.f32 %v2769_v63, 0.0  ;;  %v2698_v7 = vmul.f32 %v4918_v45, %v2497_v4 }
 0x16b   : > { %v1005_v8 = vpop.f32.mrf.mxu0  ;;  %v2499_v11 = vpop.f32.mrf.mxu1 }
 0x16c   : > { %v3929_v9 = vpack.c.bf16 %v1359_v1, %v1359_v1  ;;  %v1288_v10 = vadd.f32 %v4924_v48, %v1210_v2  ;;  %v4001_v12 = vpack.c.bf16 %v2841_v6, %v2841_v6  ;;  %v2770_v13 = vadd.f32 %v4924_v48, %v2698_v7 }
 0x16d   : > { %v1008_v14 = vpop.f32.mrf.mxu0  ;;  %v2502_v17 = vpop.f32.mrf.mxu1 }
 0x16e   : > { %1720 = vst.msk [vmem:[%s4626_s26 + $0x70] sm:$0xf] %vm1691_vm3, %v3929_v9  ;;  %v1360_v15 = vmax.f32 %v1288_v10, 0.0  ;;  %v1211_v16 = vmul.f32 %v4918_v45, %v1008_v14  ;;  %3855 = vst.msk [vmem:[%s4626_s26 + $0x190] sm:$0xf] %vm1691_vm3, %v4001_v12  ;;  %v2842_v18 = vmax.f32 %v2770_v13, 0.0  ;;  %v2699_v19 = vmul.f32 %v4918_v45, %v2502_v17 }
 0x16f   : > { %v1010_v20 = vpop.f32.mrf.mxu0  ;;  %v2504_v23 = vpop.f32.mrf.mxu1 }
 0x170   : > { %v3930_v21 = vpack.c.bf16 %v1360_v15, %v1360_v15  ;;  %v1289_v22 = vadd.f32 %v4924_v48, %v1211_v16  ;;  %v4002_v24 = vpack.c.bf16 %v2842_v18, %v2842_v18  ;;  %v2771_v25 = vadd.f32 %v4924_v48, %v2699_v19 }
 0x171   : > { %v1011_v26 = vpop.f32.mrf.mxu0  ;;  %v2505_v29 = vpop.f32.mrf.mxu1 }
 0x172   : > { %1721 = vst.msk [vmem:[%s4626_s26 + $0x74] sm:$0xf] %vm1691_vm3, %v3930_v21  ;;  %v1361_v27 = vmax.f32 %v1289_v22, 0.0  ;;  %v1212_v28 = vmul.f32 %v4918_v45, %v1011_v26  ;;  %3856 = vst.msk [vmem:[%s4626_s26 + $0x194] sm:$0xf] %vm1691_vm3, %v4002_v24  ;;  %v2843_v30 = vmax.f32 %v2771_v25, 0.0  ;;  %v2700_v31 = vmul.f32 %v4918_v45, %v2505_v29 }
 0x173   : > { %v1013_v32 = vpop.f32.mrf.mxu0  ;;  %v2507_v35 = vpop.f32.mrf.mxu1 }
 0x174   : > { %v3931_v33 = vpack.c.bf16 %v1361_v27, %v1361_v27  ;;  %v1290_v34 = vadd.f32 %v4924_v48, %v1212_v28  ;;  %v4003_v36 = vpack.c.bf16 %v2843_v30, %v2843_v30  ;;  %v2772_v37 = vadd.f32 %v4924_v48, %v2700_v31 }
 0x175   : > { %v1016_v38 = vpop.f32.mrf.mxu0  ;;  %v2510_v41 = vpop.f32.mrf.mxu1 }
 0x176   : > { %1722 = vst.msk [vmem:[%s4626_s26 + $0x78] sm:$0xf] %vm1691_vm3, %v3931_v33  ;;  %v1362_v39 = vmax.f32 %v1290_v34, 0.0  ;;  %v1213_v40 = vmul.f32 %v4918_v45, %v1016_v38  ;;  %3857 = vst.msk [vmem:[%s4626_s26 + $0x198] sm:$0xf] %vm1691_vm3, %v4003_v36  ;;  %v2844_v42 = vmax.f32 %v2772_v37, 0.0  ;;  %v2701_v43 = vmul.f32 %v4918_v45, %v2510_v41 }
 0x177   : > { %v1018_v44 = vpop.f32.mrf.mxu0  ;;  %v2512_v47 = vpop.f32.mrf.mxu1 }
 0x178   : > { %v3932_v46 = vpack.c.bf16 %v1362_v39, %v1362_v39  ;;  %v1291_v5 = vadd.f32 %v4924_v48, %v1213_v40  ;;  %v4004_v3 = vpack.c.bf16 %v2844_v42, %v2844_v42  ;;  %v2773_v49 = vadd.f32 %v4924_v48, %v2701_v43 }
 0x179   : > { %v1019_v50 = vpop.f32.mrf.mxu0  ;;  %v2513_v53 = vpop.f32.mrf.mxu1 }
 0x17a   : > { %1723 = vst.msk [vmem:[%s4626_s26 + $0x7c] sm:$0xf] %vm1691_vm3, %v3932_v46  ;;  %v1363_v51 = vmax.f32 %v1291_v5, 0.0  ;;  %v1214_v52 = vmul.f32 %v4918_v45, %v1019_v50  ;;  %3858 = vst.msk [vmem:[%s4626_s26 + $0x19c] sm:$0xf] %vm1691_vm3, %v4004_v3  ;;  %v2845_v54 = vmax.f32 %v2773_v49, 0.0  ;;  %v2702_v55 = vmul.f32 %v4918_v45, %v2513_v53 }
 0x17b   : > { %v1021_v56 = vpop.f32.mrf.mxu0  ;;  %v2515_v59 = vpop.f32.mrf.mxu1 }
 0x17c   : > { %v3933_v57 = vpack.c.bf16 %v1363_v51, %v1363_v51  ;;  %v1292_v58 = vadd.f32 %v4924_v48, %v1214_v52  ;;  %v4005_v60 = vpack.c.bf16 %v2845_v54, %v2845_v54  ;;  %v2774_v61 = vadd.f32 %v4924_v48, %v2702_v55 }
 0x17d   : > { %v1024_v62 = vpop.f32.mrf.mxu0  ;;  %v2518_v1 = vpop.f32.mrf.mxu1 }
 0x17e   : > { %1724 = vst.msk [vmem:[%s4626_s26 + $0x80] sm:$0xf] %vm1691_vm3, %v3933_v57  ;;  %v1364_v63 = vmax.f32 %v1292_v58, 0.0  ;;  %v1215_v0 = vmul.f32 %v4918_v45, %v1024_v62  ;;  %3859 = vst.msk [vmem:[%s4626_s26 + $0x1a0] sm:$0xf] %vm1691_vm3, %v4005_v60  ;;  %v2846_v2 = vmax.f32 %v2774_v61, 0.0  ;;  %v2703_v4 = vmul.f32 %v4918_v45, %v2518_v1 }
 0x17f   : > { %v1026_v6 = vpop.f32.mrf.mxu0  ;;  %v2520_v9 = vpop.f32.mrf.mxu1 }
 0x180   : > { %v3934_v7 = vpack.c.bf16 %v1364_v63, %v1364_v63  ;;  %v1293_v8 = vadd.f32 %v4924_v48, %v1215_v0  ;;  %v4006_v10 = vpack.c.bf16 %v2846_v2, %v2846_v2  ;;  %v2775_v11 = vadd.f32 %v4924_v48, %v2703_v4 }
 0x181   : > { %v1027_v12 = vpop.f32.mrf.mxu0  ;;  %v2521_v15 = vpop.f32.mrf.mxu1 }
 0x182   : > { %1725 = vst.msk [vmem:[%s4626_s26 + $0x84] sm:$0xf] %vm1691_vm3, %v3934_v7  ;;  %v1365_v13 = vmax.f32 %v1293_v8, 0.0  ;;  %v1216_v14 = vmul.f32 %v4918_v45, %v1027_v12  ;;  %3860 = vst.msk [vmem:[%s4626_s26 + $0x1a4] sm:$0xf] %vm1691_vm3, %v4006_v10  ;;  %v2847_v16 = vmax.f32 %v2775_v11, 0.0  ;;  %v2704_v17 = vmul.f32 %v4918_v45, %v2521_v15 }
 0x183   : > { %v1029_v18 = vpop.f32.mrf.mxu0  ;;  %v2523_v21 = vpop.f32.mrf.mxu1 }
 0x184   : > { %v3935_v19 = vpack.c.bf16 %v1365_v13, %v1365_v13  ;;  %v1294_v20 = vadd.f32 %v4924_v48, %v1216_v14  ;;  %v4007_v22 = vpack.c.bf16 %v2847_v16, %v2847_v16  ;;  %v2776_v23 = vadd.f32 %v4924_v48, %v2704_v17 }
 0x185   : > { %v1032_v24 = vpop.f32.mrf.mxu0  ;;  %v2526_v27 = vpop.f32.mrf.mxu1 }
 0x186   : > { %1726 = vst.msk [vmem:[%s4626_s26 + $0x88] sm:$0xf] %vm1691_vm3, %v3935_v19  ;;  %v1366_v25 = vmax.f32 %v1294_v20, 0.0  ;;  %v1217_v26 = vmul.f32 %v4918_v45, %v1032_v24  ;;  %3861 = vst.msk [vmem:[%s4626_s26 + $0x1a8] sm:$0xf] %vm1691_vm3, %v4007_v22  ;;  %v2848_v28 = vmax.f32 %v2776_v23, 0.0  ;;  %v2705_v29 = vmul.f32 %v4918_v45, %v2526_v27 }
 0x187   : > { %v1034_v30 = vpop.f32.mrf.mxu0  ;;  %v2528_v33 = vpop.f32.mrf.mxu1 }
 0x188   : > { %v3936_v31 = vpack.c.bf16 %v1366_v25, %v1366_v25  ;;  %v1295_v32 = vadd.f32 %v4924_v48, %v1217_v26  ;;  %v4008_v34 = vpack.c.bf16 %v2848_v28, %v2848_v28  ;;  %v2777_v35 = vadd.f32 %v4924_v48, %v2705_v29 }
 0x189   : > { %v1035_v36 = vpop.f32.mrf.mxu0  ;;  %v2529_v39 = vpop.f32.mrf.mxu1 }
 0x18a   : > { %1727 = vst.msk [vmem:[%s4626_s26 + $0x8c] sm:$0xf] %vm1691_vm3, %v3936_v31  ;;  %v1367_v37 = vmax.f32 %v1295_v32, 0.0  ;;  %v1218_v38 = vmul.f32 %v4918_v45, %v1035_v36  ;;  %3862 = vst.msk [vmem:[%s4626_s26 + $0x1ac] sm:$0xf] %vm1691_vm3, %v4008_v34  ;;  %v2849_v40 = vmax.f32 %v2777_v35, 0.0  ;;  %v2706_v41 = vmul.f32 %v4918_v45, %v2529_v39 }
 0x18b   : > { %v1037_v42 = vpop.f32.mrf.mxu0  ;;  %v2531_v46 = vpop.f32.mrf.mxu1 }
 0x18c   : > { %v3937_v43 = vpack.c.bf16 %v1367_v37, %v1367_v37  ;;  %v1296_v44 = vadd.f32 %v4924_v48, %v1218_v38  ;;  %v4009_v5 = vpack.c.bf16 %v2849_v40, %v2849_v40  ;;  %v2778_v47 = vadd.f32 %v4924_v48, %v2706_v41 }
 0x18d   : > { %v1040_v3 = vpop.f32.mrf.mxu0  ;;  %v2534_v51 = vpop.f32.mrf.mxu1 }
 0x18e   : > { %1728 = vst.msk [vmem:[%s4626_s26 + $0x90] sm:$0xf] %vm1691_vm3, %v3937_v43  ;;  %v1368_v49 = vmax.f32 %v1296_v44, 0.0  ;;  %v1219_v50 = vmul.f32 %v4918_v45, %v1040_v3  ;;  %3863 = vst.msk [vmem:[%s4626_s26 + $0x1b0] sm:$0xf] %vm1691_vm3, %v4009_v5  ;;  %v2850_v52 = vmax.f32 %v2778_v47, 0.0  ;;  %v2707_v53 = vmul.f32 %v4918_v45, %v2534_v51 }
 0x18f   : > { %v1042_v54 = vpop.f32.mrf.mxu0  ;;  %v2536_v57 = vpop.f32.mrf.mxu1 }
 0x190   : > { %v3938_v55 = vpack.c.bf16 %v1368_v49, %v1368_v49  ;;  %v1297_v56 = vadd.f32 %v4924_v48, %v1219_v50  ;;  %v4010_v58 = vpack.c.bf16 %v2850_v52, %v2850_v52  ;;  %v2779_v59 = vadd.f32 %v4924_v48, %v2707_v53 }
 0x191   : > { %v1043_v60 = vpop.f32.mrf.mxu0  ;;  %v2537_v63 = vpop.f32.mrf.mxu1 }
 0x192   : > { %1729 = vst.msk [vmem:[%s4626_s26 + $0x94] sm:$0xf] %vm1691_vm3, %v3938_v55  ;;  %v1369_v61 = vmax.f32 %v1297_v56, 0.0  ;;  %v1220_v62 = vmul.f32 %v4918_v45, %v1043_v60  ;;  %3864 = vst.msk [vmem:[%s4626_s26 + $0x1b4] sm:$0xf] %vm1691_vm3, %v4010_v58  ;;  %v2851_v0 = vmax.f32 %v2779_v59, 0.0  ;;  %v2708_v1 = vmul.f32 %v4918_v45, %v2537_v63 }
 0x193   : > { %v1045_v2 = vpop.f32.mrf.mxu0  ;;  %v2539_v7 = vpop.f32.mrf.mxu1 }
 0x194   : > { %v3939_v4 = vpack.c.bf16 %v1369_v61, %v1369_v61  ;;  %v1298_v6 = vadd.f32 %v4924_v48, %v1220_v62  ;;  %v4011_v8 = vpack.c.bf16 %v2851_v0, %v2851_v0  ;;  %v2780_v9 = vadd.f32 %v4924_v48, %v2708_v1 }
 0x195   : > { %v1048_v10 = vpop.f32.mrf.mxu0  ;;  %v2542_v13 = vpop.f32.mrf.mxu1 }
 0x196   : > { %1730 = vst.msk [vmem:[%s4626_s26 + $0x98] sm:$0xf] %vm1691_vm3, %v3939_v4  ;;  %v1370_v11 = vmax.f32 %v1298_v6, 0.0  ;;  %v1221_v12 = vmul.f32 %v4918_v45, %v1048_v10  ;;  %3865 = vst.msk [vmem:[%s4626_s26 + $0x1b8] sm:$0xf] %vm1691_vm3, %v4011_v8  ;;  %v2852_v14 = vmax.f32 %v2780_v9, 0.0  ;;  %v2709_v15 = vmul.f32 %v4918_v45, %v2542_v13 }
 0x197   : > { %v1050_v16 = vpop.f32.mrf.mxu0  ;;  %v2544_v19 = vpop.f32.mrf.mxu1 }
 0x198   : > { %v3940_v17 = vpack.c.bf16 %v1370_v11, %v1370_v11  ;;  %v1299_v18 = vadd.f32 %v4924_v48, %v1221_v12  ;;  %v4012_v20 = vpack.c.bf16 %v2852_v14, %v2852_v14  ;;  %v2781_v21 = vadd.f32 %v4924_v48, %v2709_v15 }
 0x199   : > { %v1051_v22 = vpop.f32.mrf.mxu0  ;;  %v2545_v25 = vpop.f32.mrf.mxu1 }
 0x19a   : > { %1731 = vst.msk [vmem:[%s4626_s26 + $0x9c] sm:$0xf] %vm1691_vm3, %v3940_v17  ;;  %v1371_v23 = vmax.f32 %v1299_v18, 0.0  ;;  %v1222_v24 = vmul.f32 %v4918_v45, %v1051_v22  ;;  %3866 = vst.msk [vmem:[%s4626_s26 + $0x1bc] sm:$0xf] %vm1691_vm3, %v4012_v20  ;;  %v2853_v26 = vmax.f32 %v2781_v21, 0.0  ;;  %v2710_v27 = vmul.f32 %v4918_v45, %v2545_v25 }
 0x19b   : > { %v1053_v28 = vpop.f32.mrf.mxu0  ;;  %v2547_v31 = vpop.f32.mrf.mxu1 }
 0x19c   : > { %v3941_v29 = vpack.c.bf16 %v1371_v23, %v1371_v23  ;;  %v1300_v30 = vadd.f32 %v4924_v48, %v1222_v24  ;;  %v4013_v32 = vpack.c.bf16 %v2853_v26, %v2853_v26  ;;  %v2782_v33 = vadd.f32 %v4924_v48, %v2710_v27 }
 0x19d   : > { %v1056_v34 = vpop.f32.mrf.mxu0  ;;  %v2550_v37 = vpop.f32.mrf.mxu1 }
 0x19e   : > { %1732 = vst.msk [vmem:[%s4626_s26 + $0xa0] sm:$0xf] %vm1691_vm3, %v3941_v29  ;;  %v1372_v35 = vmax.f32 %v1300_v30, 0.0  ;;  %v1223_v36 = vmul.f32 %v4918_v45, %v1056_v34  ;;  %3867 = vst.msk [vmem:[%s4626_s26 + $0x1c0] sm:$0xf] %vm1691_vm3, %v4013_v32  ;;  %v2854_v38 = vmax.f32 %v2782_v33, 0.0  ;;  %v2711_v39 = vmul.f32 %v4918_v45, %v2550_v37 }
 0x19f   : > { %v1058_v40 = vpop.f32.mrf.mxu0  ;;  %v2552_v43 = vpop.f32.mrf.mxu1 }
 0x1a0   : > { %v3942_v41 = vpack.c.bf16 %v1372_v35, %v1372_v35  ;;  %v1301_v42 = vadd.f32 %v4924_v48, %v1223_v36  ;;  %v4014_v44 = vpack.c.bf16 %v2854_v38, %v2854_v38  ;;  %v2783_v46 = vadd.f32 %v4924_v48, %v2711_v39 }
 0x1a1   : > { %v1059_v5 = vpop.f32.mrf.mxu0  ;;  %v2553_v49 = vpop.f32.mrf.mxu1 }
 0x1a2   : > { %1733 = vst.msk [vmem:[%s4626_s26 + $0xa4] sm:$0xf] %vm1691_vm3, %v3942_v41  ;;  %v1373_v47 = vmax.f32 %v1301_v42, 0.0  ;;  %v1224_v3 = vmul.f32 %v4918_v45, %v1059_v5  ;;  %3868 = vst.msk [vmem:[%s4626_s26 + $0x1c4] sm:$0xf] %vm1691_vm3, %v4014_v44  ;;  %v2855_v50 = vmax.f32 %v2783_v46, 0.0  ;;  %v2712_v51 = vmul.f32 %v4918_v45, %v2553_v49 }
 0x1a3   : > { %v1061_v52 = vpop.f32.mrf.mxu0  ;;  %v2555_v55 = vpop.f32.mrf.mxu1 }
 0x1a4   : > { %v3943_v53 = vpack.c.bf16 %v1373_v47, %v1373_v47  ;;  %v1302_v54 = vadd.f32 %v4924_v48, %v1224_v3  ;;  %v4015_v56 = vpack.c.bf16 %v2855_v50, %v2855_v50  ;;  %v2784_v57 = vadd.f32 %v4924_v48, %v2712_v51 }
 0x1a5   : > { %v1064_v58 = vpop.f32.mrf.mxu0  ;;  %v2558_v61 = vpop.f32.mrf.mxu1 }
 0x1a6   : > { %1734 = vst.msk [vmem:[%s4626_s26 + $0xa8] sm:$0xf] %vm1691_vm3, %v3943_v53  ;;  %v1374_v59 = vmax.f32 %v1302_v54, 0.0  ;;  %v1225_v60 = vmul.f32 %v4918_v45, %v1064_v58  ;;  %3869 = vst.msk [vmem:[%s4626_s26 + $0x1c8] sm:$0xf] %vm1691_vm3, %v4015_v56  ;;  %v2856_v62 = vmax.f32 %v2784_v57, 0.0  ;;  %v2713_v63 = vmul.f32 %v4918_v45, %v2558_v61 }
 0x1a7   : > { %v1066_v0 = vpop.f32.mrf.mxu0  ;;  %v2560_v4 = vpop.f32.mrf.mxu1 }
 0x1a8   : > { %v3944_v1 = vpack.c.bf16 %v1374_v59, %v1374_v59  ;;  %v1303_v2 = vadd.f32 %v4924_v48, %v1225_v60  ;;  %v4016_v6 = vpack.c.bf16 %v2856_v62, %v2856_v62  ;;  %v2785_v7 = vadd.f32 %v4924_v48, %v2713_v63 }
 0x1a9   : > { %v1067_v8 = vpop.f32.mrf.mxu0  ;;  %v2561_v11 = vpop.f32.mrf.mxu1 }
 0x1aa   : > { %1735 = vst.msk [vmem:[%s4626_s26 + $0xac] sm:$0xf] %vm1691_vm3, %v3944_v1  ;;  %v1375_v9 = vmax.f32 %v1303_v2, 0.0  ;;  %v1226_v10 = vmul.f32 %v4918_v45, %v1067_v8  ;;  %3870 = vst.msk [vmem:[%s4626_s26 + $0x1cc] sm:$0xf] %vm1691_vm3, %v4016_v6  ;;  %v2857_v12 = vmax.f32 %v2785_v7, 0.0  ;;  %v2714_v13 = vmul.f32 %v4918_v45, %v2561_v11 }
 0x1ab   : > { %v1069_v14 = vpop.f32.mrf.mxu0  ;;  %v2563_v17 = vpop.f32.mrf.mxu1 }
 0x1ac   : > { %v3945_v15 = vpack.c.bf16 %v1375_v9, %v1375_v9  ;;  %v1304_v16 = vadd.f32 %v4924_v48, %v1226_v10  ;;  %v4017_v18 = vpack.c.bf16 %v2857_v12, %v2857_v12  ;;  %v2786_v19 = vadd.f32 %v4924_v48, %v2714_v13 }
 0x1ad   : > { %v1072_v20 = vpop.f32.mrf.mxu0  ;;  %v2566_v23 = vpop.f32.mrf.mxu1 }
 0x1ae   : > { %1736 = vst.msk [vmem:[%s4626_s26 + $0xb0] sm:$0xf] %vm1691_vm3, %v3945_v15  ;;  %v1376_v21 = vmax.f32 %v1304_v16, 0.0  ;;  %v1227_v22 = vmul.f32 %v4918_v45, %v1072_v20  ;;  %3871 = vst.msk [vmem:[%s4626_s26 + $0x1d0] sm:$0xf] %vm1691_vm3, %v4017_v18  ;;  %v2858_v24 = vmax.f32 %v2786_v19, 0.0  ;;  %v2715_v25 = vmul.f32 %v4918_v45, %v2566_v23 }
 0x1af   : > { %v1074_v26 = vpop.f32.mrf.mxu0  ;;  %v2568_v29 = vpop.f32.mrf.mxu1 }
 0x1b0   : > { %v3946_v27 = vpack.c.bf16 %v1376_v21, %v1376_v21  ;;  %v1305_v28 = vadd.f32 %v4924_v48, %v1227_v22  ;;  %v4018_v30 = vpack.c.bf16 %v2858_v24, %v2858_v24  ;;  %v2787_v31 = vadd.f32 %v4924_v48, %v2715_v25 }
 0x1b1   : > { %v1075_v32 = vpop.f32.mrf.mxu0  ;;  %v2569_v35 = vpop.f32.mrf.mxu1 }
 0x1b2   : > { %1737 = vst.msk [vmem:[%s4626_s26 + $0xb4] sm:$0xf] %vm1691_vm3, %v3946_v27  ;;  %v1377_v33 = vmax.f32 %v1305_v28, 0.0  ;;  %v1228_v34 = vmul.f32 %v4918_v45, %v1075_v32  ;;  %3872 = vst.msk [vmem:[%s4626_s26 + $0x1d4] sm:$0xf] %vm1691_vm3, %v4018_v30  ;;  %v2859_v36 = vmax.f32 %v2787_v31, 0.0  ;;  %v2716_v37 = vmul.f32 %v4918_v45, %v2569_v35 }
 0x1b3   : > { %v1077_v38 = vpop.f32.mrf.mxu0  ;;  %v2571_v41 = vpop.f32.mrf.mxu1 }
 0x1b4   : > { %v3947_v39 = vpack.c.bf16 %v1377_v33, %v1377_v33  ;;  %v1306_v40 = vadd.f32 %v4924_v48, %v1228_v34  ;;  %v4019_v42 = vpack.c.bf16 %v2859_v36, %v2859_v36  ;;  %v2788_v43 = vadd.f32 %v4924_v48, %v2716_v37 }
 0x1b5   : > { %v1080_v44 = vpop.f32.mrf.mxu0  ;;  %v2574_v47 = vpop.f32.mrf.mxu1 }
 0x1b6   : > { %1738 = vst.msk [vmem:[%s4626_s26 + $0xb8] sm:$0xf] %vm1691_vm3, %v3947_v39  ;;  %v1378_v46 = vmax.f32 %v1306_v40, 0.0  ;;  %v1229_v5 = vmul.f32 %v4918_v45, %v1080_v44  ;;  %3873 = vst.msk [vmem:[%s4626_s26 + $0x1d8] sm:$0xf] %vm1691_vm3, %v4019_v42  ;;  %v2860_v3 = vmax.f32 %v2788_v43, 0.0  ;;  %v2717_v49 = vmul.f32 %v4918_v45, %v2574_v47 }
 0x1b7   : > { %v1082_v50 = vpop.f32.mrf.mxu0  ;;  %v2576_v53 = vpop.f32.mrf.mxu1 }
 0x1b8   : > { %v3948_v51 = vpack.c.bf16 %v1378_v46, %v1378_v46  ;;  %v1307_v52 = vadd.f32 %v4924_v48, %v1229_v5  ;;  %v4020_v54 = vpack.c.bf16 %v2860_v3, %v2860_v3  ;;  %v2789_v55 = vadd.f32 %v4924_v48, %v2717_v49 }
 0x1b9   : > { %v1083_v56 = vpop.f32.mrf.mxu0  ;;  %v2577_v59 = vpop.f32.mrf.mxu1 }
 0x1ba   : > { %1739 = vst.msk [vmem:[%s4626_s26 + $0xbc] sm:$0xf] %vm1691_vm3, %v3948_v51  ;;  %v1379_v57 = vmax.f32 %v1307_v52, 0.0  ;;  %v1230_v58 = vmul.f32 %v4918_v45, %v1083_v56  ;;  %3874 = vst.msk [vmem:[%s4626_s26 + $0x1dc] sm:$0xf] %vm1691_vm3, %v4020_v54  ;;  %v2861_v60 = vmax.f32 %v2789_v55, 0.0  ;;  %v2718_v61 = vmul.f32 %v4918_v45, %v2577_v59 }
 0x1bb   : > { %v1085_v62 = vpop.f32.mrf.mxu0  ;;  %v2579_v1 = vpop.f32.mrf.mxu1 }
 0x1bc   : > { %v3949_v63 = vpack.c.bf16 %v1379_v57, %v1379_v57  ;;  %v1308_v0 = vadd.f32 %v4924_v48, %v1230_v58  ;;  %v4021_v2 = vpack.c.bf16 %v2861_v60, %v2861_v60  ;;  %v2790_v4 = vadd.f32 %v4924_v48, %v2718_v61 }
 0x1bd   : > { %v1088_v6 = vpop.f32.mrf.mxu0  ;;  %v2582_v9 = vpop.f32.mrf.mxu1 }
 0x1be   : > { %1740 = vst.msk [vmem:[%s4626_s26 + $0xc0] sm:$0xf] %vm1691_vm3, %v3949_v63  ;;  %v1380_v7 = vmax.f32 %v1308_v0, 0.0  ;;  %v1231_v8 = vmul.f32 %v4918_v45, %v1088_v6  ;;  %3875 = vst.msk [vmem:[%s4626_s26 + $0x1e0] sm:$0xf] %vm1691_vm3, %v4021_v2  ;;  %v2862_v10 = vmax.f32 %v2790_v4, 0.0  ;;  %v2719_v11 = vmul.f32 %v4918_v45, %v2582_v9 }
 0x1bf   : > { %v1090_v12 = vpop.f32.mrf.mxu0  ;;  %v2584_v15 = vpop.f32.mrf.mxu1 }
 0x1c0   : > { %v3950_v13 = vpack.c.bf16 %v1380_v7, %v1380_v7  ;;  %v1309_v14 = vadd.f32 %v4924_v48, %v1231_v8  ;;  %v4022_v16 = vpack.c.bf16 %v2862_v10, %v2862_v10  ;;  %v2791_v17 = vadd.f32 %v4924_v48, %v2719_v11 }
 0x1c1   : > { %v1091_v18 = vpop.f32.mrf.mxu0  ;;  %v2585_v21 = vpop.f32.mrf.mxu1 }
 0x1c2   : > { %1741 = vst.msk [vmem:[%s4626_s26 + $0xc4] sm:$0xf] %vm1691_vm3, %v3950_v13  ;;  %v1381_v19 = vmax.f32 %v1309_v14, 0.0  ;;  %v1232_v20 = vmul.f32 %v4918_v45, %v1091_v18  ;;  %3876 = vst.msk [vmem:[%s4626_s26 + $0x1e4] sm:$0xf] %vm1691_vm3, %v4022_v16  ;;  %v2863_v22 = vmax.f32 %v2791_v17, 0.0  ;;  %v2720_v23 = vmul.f32 %v4918_v45, %v2585_v21 }
 0x1c3   : > { %v1093_v24 = vpop.f32.mrf.mxu0  ;;  %v2587_v27 = vpop.f32.mrf.mxu1 }
 0x1c4   : > { %v3951_v25 = vpack.c.bf16 %v1381_v19, %v1381_v19  ;;  %v1310_v26 = vadd.f32 %v4924_v48, %v1232_v20  ;;  %v4023_v28 = vpack.c.bf16 %v2863_v22, %v2863_v22  ;;  %v2792_v29 = vadd.f32 %v4924_v48, %v2720_v23 }
 0x1c5   : > { %v1096_v30 = vpop.f32.mrf.mxu0  ;;  %v2590_v33 = vpop.f32.mrf.mxu1 }
 0x1c6   : > { %1742 = vst.msk [vmem:[%s4626_s26 + $0xc8] sm:$0xf] %vm1691_vm3, %v3951_v25  ;;  %v1382_v31 = vmax.f32 %v1310_v26, 0.0  ;;  %v1233_v32 = vmul.f32 %v4918_v45, %v1096_v30  ;;  %3877 = vst.msk [vmem:[%s4626_s26 + $0x1e8] sm:$0xf] %vm1691_vm3, %v4023_v28  ;;  %v2864_v34 = vmax.f32 %v2792_v29, 0.0  ;;  %v2721_v35 = vmul.f32 %v4918_v45, %v2590_v33 }
 0x1c7   : > { %v1098_v36 = vpop.f32.mrf.mxu0  ;;  %v2592_v39 = vpop.f32.mrf.mxu1 }
 0x1c8   : > { %v3952_v37 = vpack.c.bf16 %v1382_v31, %v1382_v31  ;;  %v1311_v38 = vadd.f32 %v4924_v48, %v1233_v32  ;;  %v4024_v40 = vpack.c.bf16 %v2864_v34, %v2864_v34  ;;  %v2793_v41 = vadd.f32 %v4924_v48, %v2721_v35 }
 0x1c9   : > { %v1099_v42 = vpop.f32.mrf.mxu0  ;;  %v2593_v46 = vpop.f32.mrf.mxu1 }
 0x1ca   : > { %1743 = vst.msk [vmem:[%s4626_s26 + $0xcc] sm:$0xf] %vm1691_vm3, %v3952_v37  ;;  %v1383_v43 = vmax.f32 %v1311_v38, 0.0  ;;  %v1234_v44 = vmul.f32 %v4918_v45, %v1099_v42  ;;  %3878 = vst.msk [vmem:[%s4626_s26 + $0x1ec] sm:$0xf] %vm1691_vm3, %v4024_v40  ;;  %v2865_v5 = vmax.f32 %v2793_v41, 0.0  ;;  %v2722_v47 = vmul.f32 %v4918_v45, %v2593_v46 }
 0x1cb   : > { %v1101_v3 = vpop.f32.mrf.mxu0  ;;  %v2595_v51 = vpop.f32.mrf.mxu1 }
 0x1cc   : > { %v3953_v49 = vpack.c.bf16 %v1383_v43, %v1383_v43  ;;  %v1312_v50 = vadd.f32 %v4924_v48, %v1234_v44  ;;  %v4025_v52 = vpack.c.bf16 %v2865_v5, %v2865_v5  ;;  %v2794_v53 = vadd.f32 %v4924_v48, %v2722_v47 }
 0x1cd   : > { %v1104_v54 = vpop.f32.mrf.mxu0  ;;  %v2598_v57 = vpop.f32.mrf.mxu1 }
 0x1ce   : > { %1744 = vst.msk [vmem:[%s4626_s26 + $0xd0] sm:$0xf] %vm1691_vm3, %v3953_v49  ;;  %v1384_v55 = vmax.f32 %v1312_v50, 0.0  ;;  %v1235_v56 = vmul.f32 %v4918_v45, %v1104_v54  ;;  %3879 = vst.msk [vmem:[%s4626_s26 + $0x1f0] sm:$0xf] %vm1691_vm3, %v4025_v52  ;;  %v2866_v58 = vmax.f32 %v2794_v53, 0.0  ;;  %v2723_v59 = vmul.f32 %v4918_v45, %v2598_v57 }
 0x1cf   : > { %v1106_v60 = vpop.f32.mrf.mxu0  ;;  %v2600_v63 = vpop.f32.mrf.mxu1 }
 0x1d0   : > { %v3954_v61 = vpack.c.bf16 %v1384_v55, %v1384_v55  ;;  %v1313_v62 = vadd.f32 %v4924_v48, %v1235_v56  ;;  %v4026_v0 = vpack.c.bf16 %v2866_v58, %v2866_v58  ;;  %v2795_v1 = vadd.f32 %v4924_v48, %v2723_v59 }
 0x1d1   : > { %v1107_v2 = vpop.f32.mrf.mxu0  ;;  %v2601_v7 = vpop.f32.mrf.mxu1 }
 0x1d2   : > { %1745 = vst.msk [vmem:[%s4626_s26 + $0xd4] sm:$0xf] %vm1691_vm3, %v3954_v61  ;;  %v1385_v4 = vmax.f32 %v1313_v62, 0.0  ;;  %v1236_v6 = vmul.f32 %v4918_v45, %v1107_v2  ;;  %3880 = vst.msk [vmem:[%s4626_s26 + $0x1f4] sm:$0xf] %vm1691_vm3, %v4026_v0  ;;  %v2867_v8 = vmax.f32 %v2795_v1, 0.0  ;;  %v2724_v9 = vmul.f32 %v4918_v45, %v2601_v7 }
 0x1d3   : > { %v1109_v10 = vpop.f32.mrf.mxu0  ;;  %v2603_v13 = vpop.f32.mrf.mxu1 }
 0x1d4   : > { %v3955_v11 = vpack.c.bf16 %v1385_v4, %v1385_v4  ;;  %v1314_v12 = vadd.f32 %v4924_v48, %v1236_v6  ;;  %v4027_v14 = vpack.c.bf16 %v2867_v8, %v2867_v8  ;;  %v2796_v15 = vadd.f32 %v4924_v48, %v2724_v9 }
 0x1d5   : > { %v1112_v16 = vpop.f32.mrf.mxu0  ;;  %v2606_v19 = vpop.f32.mrf.mxu1 }
 0x1d6   : > { %1746 = vst.msk [vmem:[%s4626_s26 + $0xd8] sm:$0xf] %vm1691_vm3, %v3955_v11  ;;  %v1386_v17 = vmax.f32 %v1314_v12, 0.0  ;;  %v1237_v18 = vmul.f32 %v4918_v45, %v1112_v16  ;;  %3881 = vst.msk [vmem:[%s4626_s26 + $0x1f8] sm:$0xf] %vm1691_vm3, %v4027_v14  ;;  %v2868_v20 = vmax.f32 %v2796_v15, 0.0  ;;  %v2725_v21 = vmul.f32 %v4918_v45, %v2606_v19 }
 0x1d7   : > { %v1114_v22 = vpop.f32.mrf.mxu0  ;;  %v2608_v25 = vpop.f32.mrf.mxu1 }
 0x1d8   : > { %v3956_v23 = vpack.c.bf16 %v1386_v17, %v1386_v17  ;;  %v1315_v24 = vadd.f32 %v4924_v48, %v1237_v18  ;;  %v4028_v26 = vpack.c.bf16 %v2868_v20, %v2868_v20  ;;  %v2797_v27 = vadd.f32 %v4924_v48, %v2725_v21 }
 0x1d9   : > { %v1115_v28 = vpop.f32.mrf.mxu0  ;;  %v2609_v31 = vpop.f32.mrf.mxu1 }
 0x1da   : > { %1747 = vst.msk [vmem:[%s4626_s26 + $0xdc] sm:$0xf] %vm1691_vm3, %v3956_v23  ;;  %v1387_v29 = vmax.f32 %v1315_v24, 0.0  ;;  %v1238_v30 = vmul.f32 %v4918_v45, %v1115_v28  ;;  %3882 = vst.msk [vmem:[%s4626_s26 + $0x1fc] sm:$0xf] %vm1691_vm3, %v4028_v26  ;;  %v2869_v32 = vmax.f32 %v2797_v27, 0.0  ;;  %v2726_v33 = vmul.f32 %v4918_v45, %v2609_v31 }
 0x1db   : > { %v1117_v34 = vpop.f32.mrf.mxu0  ;;  %v2611_v37 = vpop.f32.mrf.mxu1 }
 0x1dc   : > { %v3957_v35 = vpack.c.bf16 %v1387_v29, %v1387_v29  ;;  %v1316_v36 = vadd.f32 %v4924_v48, %v1238_v30  ;;  %v4029_v38 = vpack.c.bf16 %v2869_v32, %v2869_v32  ;;  %v2798_v39 = vadd.f32 %v4924_v48, %v2726_v33 }
 0x1dd   : > { %v1120_v40 = vpop.f32.mrf.mxu0  ;;  %v2614_v43 = vpop.f32.mrf.mxu1 }
 0x1de   : > { %1748 = vst.msk [vmem:[%s4626_s26 + $0xe0] sm:$0xf] %vm1691_vm3, %v3957_v35  ;;  %v1388_v41 = vmax.f32 %v1316_v36, 0.0  ;;  %v1239_v42 = vmul.f32 %v4918_v45, %v1120_v40  ;;  %3883 = vst.msk [vmem:[%s4626_s26 + $0x200] sm:$0xf] %vm1691_vm3, %v4029_v38  ;;  %v2870_v44 = vmax.f32 %v2798_v39, 0.0  ;;  %v2727_v46 = vmul.f32 %v4918_v45, %v2614_v43 }
 0x1df   : > { %v1122_v5 = vpop.f32.mrf.mxu0  ;;  %v2616_v49 = vpop.f32.mrf.mxu1 }
 0x1e0   : > { %v3958_v47 = vpack.c.bf16 %v1388_v41, %v1388_v41  ;;  %v1317_v3 = vadd.f32 %v4924_v48, %v1239_v42  ;;  %v4030_v50 = vpack.c.bf16 %v2870_v44, %v2870_v44  ;;  %v2799_v51 = vadd.f32 %v4924_v48, %v2727_v46 }
 0x1e1   : > { %v1123_v52 = vpop.f32.mrf.mxu0  ;;  %v2617_v55 = vpop.f32.mrf.mxu1 }
 0x1e2   : > { %1749 = vst.msk [vmem:[%s4626_s26 + $0xe4] sm:$0xf] %vm1691_vm3, %v3958_v47  ;;  %v1389_v53 = vmax.f32 %v1317_v3, 0.0  ;;  %v1240_v54 = vmul.f32 %v4918_v45, %v1123_v52  ;;  %3884 = vst.msk [vmem:[%s4626_s26 + $0x204] sm:$0xf] %vm1691_vm3, %v4030_v50  ;;  %v2871_v56 = vmax.f32 %v2799_v51, 0.0  ;;  %v2728_v57 = vmul.f32 %v4918_v45, %v2617_v55 }
 0x1e3   : > { %v1125_v58 = vpop.f32.mrf.mxu0  ;;  %v2619_v61 = vpop.f32.mrf.mxu1  ;;  %v5221_v52 = vld [vmem:[%s5309_s2] ss:$0 sm:$0xff] }
 0x1e4   : > { %v3959_v59 = vpack.c.bf16 %v1389_v53, %v1389_v53  ;;  %v1318_v60 = vadd.f32 %v4924_v48, %v1240_v54  ;;  %v4031_v62 = vpack.c.bf16 %v2871_v56, %v2871_v56  ;;  %v2800_v63 = vadd.f32 %v4924_v48, %v2728_v57  ;;  %v5230_v57 = vld [vmem:[%s5310_s3] ss:$0 sm:$0xff] }
 0x1e5   : > { %v1128_v0 = vpop.f32.mrf.mxu0  ;;  %v2622_v4 = vpop.f32.mrf.mxu1 }
 0x1e6   : > { %1750 = vst.msk [vmem:[%s4626_s26 + $0xe8] sm:$0xf] %vm1691_vm3, %v3959_v59  ;;  %v1390_v1 = vmax.f32 %v1318_v60, 0.0  ;;  %v1241_v2 = vmul.f32 %v4918_v45, %v1128_v0  ;;  %3885 = vst.msk [vmem:[%s4626_s26 + $0x208] sm:$0xf] %vm1691_vm3, %v4031_v62  ;;  %v2872_v6 = vmax.f32 %v2800_v63, 0.0  ;;  %v2729_v7 = vmul.f32 %v4918_v45, %v2622_v4 }
 0x1e7   : > { %v1130_v8 = vpop.f32.mrf.mxu0  ;;  %v2624_v11 = vpop.f32.mrf.mxu1 }
 0x1e8   : > { %v3960_v9 = vpack.c.bf16 %v1390_v1, %v1390_v1  ;;  %v1319_v10 = vadd.f32 %v4924_v48, %v1241_v2  ;;  %v4032_v12 = vpack.c.bf16 %v2872_v6, %v2872_v6  ;;  %v2801_v13 = vadd.f32 %v4924_v48, %v2729_v7 }
 0x1e9   : > { %v1131_v14 = vpop.f32.mrf.mxu0  ;;  %v2625_v17 = vpop.f32.mrf.mxu1 }
 0x1ea   : > { %1751 = vst.msk [vmem:[%s4626_s26 + $0xec] sm:$0xf] %vm1691_vm3, %v3960_v9  ;;  %v1391_v15 = vmax.f32 %v1319_v10, 0.0  ;;  %v1242_v16 = vmul.f32 %v4918_v45, %v1131_v14  ;;  %3886 = vst.msk [vmem:[%s4626_s26 + $0x20c] sm:$0xf] %vm1691_vm3, %v4032_v12  ;;  %v2873_v18 = vmax.f32 %v2801_v13, 0.0  ;;  %v2730_v19 = vmul.f32 %v4918_v45, %v2625_v17 }
 0x1eb   : > { %v1133_v20 = vpop.f32.mrf.mxu0  ;;  %v2627_v23 = vpop.f32.mrf.mxu1 }
 0x1ec   : > { %v3961_v21 = vpack.c.bf16 %v1391_v15, %v1391_v15  ;;  %v1320_v22 = vadd.f32 %v4924_v48, %v1242_v16  ;;  %v4033_v24 = vpack.c.bf16 %v2873_v18, %v2873_v18  ;;  %v2802_v25 = vadd.f32 %v4924_v48, %v2730_v19 }
 0x1ed   : > { %v1136_v26 = vpop.f32.mrf.mxu0  ;;  %v2630_v29 = vpop.f32.mrf.mxu1 }
 0x1ee   : > { %1752 = vst.msk [vmem:[%s4626_s26 + $0xf0] sm:$0xf] %vm1691_vm3, %v3961_v21  ;;  %v1392_v27 = vmax.f32 %v1320_v22, 0.0  ;;  %v1243_v28 = vmul.f32 %v4918_v45, %v1136_v26  ;;  %3887 = vst.msk [vmem:[%s4626_s26 + $0x210] sm:$0xf] %vm1691_vm3, %v4033_v24  ;;  %v2874_v30 = vmax.f32 %v2802_v25, 0.0  ;;  %v2731_v31 = vmul.f32 %v4918_v45, %v2630_v29 }
 0x1ef   : > { %v1138_v32 = vpop.f32.mrf.mxu0  ;;  %v2632_v35 = vpop.f32.mrf.mxu1 }
 0x1f0   : > { %v3962_v33 = vpack.c.bf16 %v1392_v27, %v1392_v27  ;;  %v1321_v34 = vadd.f32 %v4924_v48, %v1243_v28  ;;  %v4034_v36 = vpack.c.bf16 %v2874_v30, %v2874_v30  ;;  %v2803_v37 = vadd.f32 %v4924_v48, %v2731_v31 }
 0x1f1   : > { %v1139_v38 = vpop.f32.mrf.mxu0  ;;  %v2633_v41 = vpop.f32.mrf.mxu1 }
 0x1f2   : > { %1753 = vst.msk [vmem:[%s4626_s26 + $0xf4] sm:$0xf] %vm1691_vm3, %v3962_v33  ;;  %v1393_v39 = vmax.f32 %v1321_v34, 0.0  ;;  %v1244_v40 = vmul.f32 %v4918_v45, %v1139_v38  ;;  %3888 = vst.msk [vmem:[%s4626_s26 + $0x214] sm:$0xf] %vm1691_vm3, %v4034_v36  ;;  %v2875_v42 = vmax.f32 %v2803_v37, 0.0  ;;  %v2732_v43 = vmul.f32 %v4918_v45, %v2633_v41 }
 0x1f3   : > { %v1141_v44 = vpop.f32.mrf.mxu0  ;;  %v2635_v47 = vpop.f32.mrf.mxu1 }
 0x1f4   : > { %v3963_v46 = vpack.c.bf16 %v1393_v39, %v1393_v39  ;;  %v1322_v5 = vadd.f32 %v4924_v48, %v1244_v40  ;;  %v4035_v3 = vpack.c.bf16 %v2875_v42, %v2875_v42  ;;  %v2804_v49 = vadd.f32 %v4924_v48, %v2732_v43 }
 0x1f5   : > { %v1144_v50 = vpop.f32.mrf.mxu0  ;;  %v2638_v53 = vpop.f32.mrf.mxu1 }
 0x1f6   : > { %1754 = vst.msk [vmem:[%s4626_s26 + $0xf8] sm:$0xf] %vm1691_vm3, %v3963_v46  ;;  %v1394_v51 = vmax.f32 %v1322_v5, 0.0  ;;  %v1245_v45 = vmul.f32 %v5221_v52, %v1144_v50  ;;  %3889 = vst.msk [vmem:[%s4626_s26 + $0x218] sm:$0xf] %vm1691_vm3, %v4035_v3  ;;  %v2876_v54 = vmax.f32 %v2804_v49, 0.0  ;;  %v2733_v55 = vmul.f32 %v5221_v52, %v2638_v53 }
 0x1f7   : > { %v1146_v48 = vpop.f32.mrf.mxu0  ;;  %v2640_v59 = vpop.f32.mrf.mxu1 }
 0x1f8   : > { %v3964_v56 = vpack.c.bf16 %v1394_v51, %v1394_v51  ;;  %v1323_v58 = vadd.f32 %v5230_v57, %v1245_v45  ;;  %v4036_v60 = vpack.c.bf16 %v2876_v54, %v2876_v54  ;;  %v2805_v61 = vadd.f32 %v5230_v57, %v2733_v55 }
 0x1f9   : > { %v1147_v62 = vpop.f32.mrf.mxu0  ;;  %v2641_v1 = vpop.f32.mrf.mxu1 }
 0x1fa   : > { %1755 = vst.msk [vmem:[%s4626_s26 + $0xfc] sm:$0xf] %vm1691_vm3, %v3964_v56  ;;  %v1395_v63 = vmax.f32 %v1323_v58, 0.0  ;;  %v1246_v0 = vmul.f32 %v5221_v52, %v1147_v62  ;;  %3890 = vst.msk [vmem:[%s4626_s26 + $0x21c] sm:$0xf] %vm1691_vm3, %v4036_v60  ;;  %v2877_v2 = vmax.f32 %v2805_v61, 0.0  ;;  %v2734_v4 = vmul.f32 %v5221_v52, %v2641_v1 }
 0x1fb   : > { %v1149_v6 = vpop.f32.mrf.mxu0  ;;  %v2643_v9 = vpop.f32.mrf.mxu1 }
 0x1fc   : > { %v3965_v7 = vpack.c.bf16 %v1395_v63, %v1395_v63  ;;  %v1324_v8 = vadd.f32 %v5230_v57, %v1246_v0  ;;  %v4037_v10 = vpack.c.bf16 %v2877_v2, %v2877_v2  ;;  %v2806_v11 = vadd.f32 %v5230_v57, %v2734_v4 }
 0x1fd   : > { %v1152_v12 = vpop.f32.mrf.mxu0  ;;  %v2646_v15 = vpop.f32.mrf.mxu1 }
 0x1fe   : > { %1756 = vst.msk [vmem:[%s4626_s26 + $0x100] sm:$0xf] %vm1691_vm3, %v3965_v7  ;;  %v1396_v13 = vmax.f32 %v1324_v8, 0.0  ;;  %v1247_v14 = vmul.f32 %v5221_v52, %v1152_v12  ;;  %3891 = vst.msk [vmem:[%s4626_s26 + $0x220] sm:$0xf] %vm1691_vm3, %v4037_v10  ;;  %v2878_v16 = vmax.f32 %v2806_v11, 0.0  ;;  %v2735_v17 = vmul.f32 %v5221_v52, %v2646_v15 }
 0x1ff   : > { %v1154_v18 = vpop.f32.mrf.mxu0  ;;  %v2648_v21 = vpop.f32.mrf.mxu1 }
 0x200   : > { %v3966_v19 = vpack.c.bf16 %v1396_v13, %v1396_v13  ;;  %v1325_v20 = vadd.f32 %v5230_v57, %v1247_v14  ;;  %v4038_v22 = vpack.c.bf16 %v2878_v16, %v2878_v16  ;;  %v2807_v23 = vadd.f32 %v5230_v57, %v2735_v17 }
 0x201   : > { %v1155_v24 = vpop.f32.mrf.mxu0  ;;  %v2649_v27 = vpop.f32.mrf.mxu1 }
 0x202   : > { %1757 = vst.msk [vmem:[%s4626_s26 + $0x104] sm:$0xf] %vm1691_vm3, %v3966_v19  ;;  %v1397_v25 = vmax.f32 %v1325_v20, 0.0  ;;  %v1248_v26 = vmul.f32 %v5221_v52, %v1155_v24  ;;  %3892 = vst.msk [vmem:[%s4626_s26 + $0x224] sm:$0xf] %vm1691_vm3, %v4038_v22  ;;  %v2879_v28 = vmax.f32 %v2807_v23, 0.0  ;;  %v2736_v29 = vmul.f32 %v5221_v52, %v2649_v27 }
 0x203   : > { %v1157_v30 = vpop.f32.mrf.mxu0  ;;  %v2651_v33 = vpop.f32.mrf.mxu1 }
 0x204   : > { %v3967_v31 = vpack.c.bf16 %v1397_v25, %v1397_v25  ;;  %v1326_v32 = vadd.f32 %v5230_v57, %v1248_v26  ;;  %v4039_v34 = vpack.c.bf16 %v2879_v28, %v2879_v28  ;;  %v2808_v35 = vadd.f32 %v5230_v57, %v2736_v29 }
 0x205   : > { %v1160_v36 = vpop.f32.mrf.mxu0  ;;  %v2654_v39 = vpop.f32.mrf.mxu1 }
 0x206   : > { %1758 = vst.msk [vmem:[%s4626_s26 + $0x108] sm:$0xf] %vm1691_vm3, %v3967_v31  ;;  %v1398_v37 = vmax.f32 %v1326_v32, 0.0  ;;  %v1249_v38 = vmul.f32 %v5221_v52, %v1160_v36  ;;  %3893 = vst.msk [vmem:[%s4626_s26 + $0x228] sm:$0xf] %vm1691_vm3, %v4039_v34  ;;  %v2880_v40 = vmax.f32 %v2808_v35, 0.0  ;;  %v2737_v41 = vmul.f32 %v5221_v52, %v2654_v39 }
 0x207   : > { %v1162_v42 = vpop.f32.mrf.mxu0  ;;  %v2656_v46 = vpop.f32.mrf.mxu1 }
 0x208   : > { %v3968_v43 = vpack.c.bf16 %v1398_v37, %v1398_v37  ;;  %v1327_v44 = vadd.f32 %v5230_v57, %v1249_v38  ;;  %v4040_v5 = vpack.c.bf16 %v2880_v40, %v2880_v40  ;;  %v2809_v47 = vadd.f32 %v5230_v57, %v2737_v41 }
 0x209   : > { %v1163_v3 = vpop.f32.mrf.mxu0  ;;  %v2657_v51 = vpop.f32.mrf.mxu1 }
 0x20a   : > { %1759 = vst.msk [vmem:[%s4626_s26 + $0x10c] sm:$0xf] %vm1691_vm3, %v3968_v43  ;;  %v1399_v49 = vmax.f32 %v1327_v44, 0.0  ;;  %v1250_v50 = vmul.f32 %v5221_v52, %v1163_v3  ;;  %3894 = vst.msk [vmem:[%s4626_s26 + $0x22c] sm:$0xf] %vm1691_vm3, %v4040_v5  ;;  %v2881_v45 = vmax.f32 %v2809_v47, 0.0  ;;  %v2738_v53 = vmul.f32 %v5221_v52, %v2657_v51 }
 0x20b   : > { %v1165_v54 = vpop.f32.mrf.mxu0  ;;  %v2659_v56 = vpop.f32.mrf.mxu1 }
 0x20c   : > { %v3969_v55 = vpack.c.bf16 %v1399_v49, %v1399_v49  ;;  %v1328_v48 = vadd.f32 %v5230_v57, %v1250_v50  ;;  %v4041_v58 = vpack.c.bf16 %v2881_v45, %v2881_v45  ;;  %v2810_v59 = vadd.f32 %v5230_v57, %v2738_v53 }
 0x20d   : > { %v1168_v60 = vpop.f32.mrf.mxu0  ;;  %v2662_v63 = vpop.f32.mrf.mxu1 }
 0x20e   : > { %1760 = vst.msk [vmem:[%s4626_s26 + $0x110] sm:$0xf] %vm1691_vm3, %v3969_v55  ;;  %v1400_v61 = vmax.f32 %v1328_v48, 0.0  ;;  %v1251_v62 = vmul.f32 %v5221_v52, %v1168_v60  ;;  %3895 = vst.msk [vmem:[%s4626_s26 + $0x230] sm:$0xf] %vm1691_vm3, %v4041_v58  ;;  %v2882_v0 = vmax.f32 %v2810_v59, 0.0  ;;  %v2739_v1 = vmul.f32 %v5221_v52, %v2662_v63 }
 0x20f   : > { %v1170_v2 = vpop.f32.mrf.mxu0  ;;  %v2664_v7 = vpop.f32.mrf.mxu1 }
 0x210   : > { %v3970_v4 = vpack.c.bf16 %v1400_v61, %v1400_v61  ;;  %v1329_v6 = vadd.f32 %v5230_v57, %v1251_v62  ;;  %v4042_v8 = vpack.c.bf16 %v2882_v0, %v2882_v0  ;;  %v2811_v9 = vadd.f32 %v5230_v57, %v2739_v1 }
 0x211   : > { %v1171_v10 = vpop.f32.mrf.mxu0  ;;  %v2665_v13 = vpop.f32.mrf.mxu1 }
 0x212   : > { %1761 = vst.msk [vmem:[%s4626_s26 + $0x114] sm:$0xf] %vm1691_vm3, %v3970_v4  ;;  %v1401_v11 = vmax.f32 %v1329_v6, 0.0  ;;  %v1252_v12 = vmul.f32 %v5221_v52, %v1171_v10  ;;  %3896 = vst.msk [vmem:[%s4626_s26 + $0x234] sm:$0xf] %vm1691_vm3, %v4042_v8  ;;  %v2883_v14 = vmax.f32 %v2811_v9, 0.0  ;;  %v2740_v15 = vmul.f32 %v5221_v52, %v2665_v13 }
 0x213   : > { %v1173_v16 = vpop.f32.mrf.mxu0  ;;  %v2667_v19 = vpop.f32.mrf.mxu1 }
 0x214   : > { %v3971_v17 = vpack.c.bf16 %v1401_v11, %v1401_v11  ;;  %v1330_v18 = vadd.f32 %v5230_v57, %v1252_v12  ;;  %v4043_v20 = vpack.c.bf16 %v2883_v14, %v2883_v14  ;;  %v2812_v21 = vadd.f32 %v5230_v57, %v2740_v15 }
 0x216   : > { %1762 = vst.msk [vmem:[%s4626_s26 + $0x118] sm:$0xf] %vm1691_vm3, %v3971_v17  ;;  %v1402_v22 = vmax.f32 %v1330_v18, 0.0  ;;  %3897 = vst.msk [vmem:[%s4626_s26 + $0x238] sm:$0xf] %vm1691_vm3, %v4043_v20  ;;  %v2884_v23 = vmax.f32 %v2812_v21, 0.0 }
 0x218   : > { %v3972_v24 = vpack.c.bf16 %v1402_v22, %v1402_v22  ;;  %v4044_v25 = vpack.c.bf16 %v2884_v23, %v2884_v23 }
 0x21a   : > { %1763 = vst.msk [vmem:[%s4626_s26 + $0x11c] sm:$0xf] %vm1691_vm3, %v3972_v24  ;;  %3898 = vst.msk [vmem:[%s4626_s26 + $0x23c] sm:$0xf] %vm1691_vm3, %v4044_v25 }
 0x21b PF: > { %s14_s17 = sadd.s32 1, %s4311_s17   ;;  %s5312_s15 = smov %s4307_s16 }
 0x21c   : > { %p11_p5 = scmp.ge.s32.totalorder %s14_s17, 4   ;;  %s5313_s16 = smov %s5315_s18 }
 0x21e   :  { %13 = sbr.rel (!%p11_p5) target bundleno = 2 (0x2), region = 77 }

</bundles_post_ra>
